<compile_context>
chip_gen: v6e
topology: v6e:2x2x1
jax: 0.10.0
libtpu: 0.0.40
codegen_flags: <defaults>
</compile_context>

<pallas_src>
import functools

import numpy as np
import jax
import jax.numpy as jnp
from jax.experimental import pallas as pl
from jax.experimental.pallas import tpu as pltpu

# Full-precision f32 matmuls for both the kernels and the pure-JAX reference so
# the correctness comparison is apples-to-apples.
jax.config.update("jax_default_matmul_precision", "highest")

_VMEM_LIMIT = 64 * 1024 * 1024  # explicit scoped-VMEM budget (fits v7x's 64 MiB)


def _pick_tile(total, candidates):
    """Largest candidate tile that divides `total`, else the full extent."""
    for t in candidates:
        if total % t == 0:
            return t
    return total


# ----------------------------- Pallas kernels ------------------------------

def _gn_qkv_kernel(x_ref, gmap_ref, wq_ref, wk_ref, wv_ref,
                   bq_ref, bk_ref, bv_ref,
                   q_ref, k_ref, v_ref, *, num_groups, eps):
    # x_ref: (1, C, S)   gmap_ref: (C, C) one-hot "same group" matrix
    # w*_ref: (C, C) pre-transposed (in, out)   b*_ref: (1, C)
    # outputs q/k/v: (1, S, C)
    x = x_ref[0].astype(jnp.float32)          # (C, S)
    C, S = x.shape
    cpg = C // num_groups

    h = x.T                                    # (S, C) — on-VMEM transpose (XLU)

    # GroupNorm statistics without in-kernel reshapes: per-channel sums over the
    # spatial axis, then per-group broadcast via a (C, C) one-hot matmul.
    ch_sum = jnp.sum(h, axis=0, keepdims=True)           # (1, C)
    ch_sq = jnp.sum(h * h, axis=0, keepdims=True)        # (1, C)
    inv_n = 1.0 / float(cpg * S)
    mean = jnp.dot(ch_sum, gmap_ref[...],
                   preferred_element_type=jnp.float32) * inv_n      # (1, C)
    ex2 = jnp.dot(ch_sq, gmap_ref[...],
                  preferred_element_type=jnp.float32) * inv_n       # (1, C)
    var = ex2 - mean * mean
    hn = (h - mean) * jax.lax.rsqrt(var + eps)            # (S, C)

    q_ref[0] = (jnp.dot(hn, wq_ref[...], preferred_element_type=jnp.float32)
                + bq_ref[...]).astype(q_ref.dtype)
    k_ref[0] = (jnp.dot(hn, wk_ref[...], preferred_element_type=jnp.float32)
                + bk_ref[...]).astype(k_ref.dtype)
    v_ref[0] = (jnp.dot(hn, wv_ref[...], preferred_element_type=jnp.float32)
                + bv_ref[...]).astype(v_ref.dtype)


def _flash_attn_kernel(q_ref, k_ref, v_ref, o_ref, m_sc, l_sc, acc_sc, *, scale):
    # q_ref: (1, tq, C)  k_ref/v_ref: (1, tk, C)  o_ref: (1, tq, C)
    # scratch: m_sc/l_sc (tq, 1) f32, acc_sc (tq, C) f32
    ki = pl.program_id(2)

    @pl.when(ki == 0)
    def _():
        m_sc[...] = jnp.full_like(m_sc, -jnp.inf)
        l_sc[...] = jnp.zeros_like(l_sc)
        acc_sc[...] = jnp.zeros_like(acc_sc)

    q = q_ref[0].astype(jnp.float32) * scale              # (tq, C)
    k = k_ref[0].astype(jnp.float32)                      # (tk, C)
    s = jax.lax.dot_general(q, k, (((1,), (1,)), ((), ())),
                            preferred_element_type=jnp.float32)      # (tq, tk)

    m_prev = m_sc[...]
    m_new = jnp.maximum(m_prev, jnp.max(s, axis=-1, keepdims=True))
    alpha = jnp.exp(m_prev - m_new)
    p = jnp.exp(s - m_new)

    l_sc[...] = alpha * l_sc[...] + jnp.sum(p, axis=-1, keepdims=True)
    acc_sc[...] = alpha * acc_sc[...] + jnp.dot(
        p, v_ref[0].astype(jnp.float32), preferred_element_type=jnp.float32)
    m_sc[...] = m_new

    @pl.when(ki == pl.num_programs(2) - 1)
    def _():
        o_ref[0] = (acc_sc[...] / l_sc[...]).astype(o_ref.dtype)


def _proj_residual_kernel(attn_ref, x_ref, wp_ref, bp_ref, o_ref):
    # attn_ref: (1, ts, C)  x_ref/o_ref: (1, C, ts)  wp_ref: (C, C)  bp_ref: (1, C)
    a = attn_ref[0].astype(jnp.float32)                   # (ts, C)
    p = jnp.dot(a, wp_ref[...], preferred_element_type=jnp.float32) + bp_ref[...]
    o_ref[0] = (x_ref[0].astype(jnp.float32) + p.T).astype(o_ref.dtype)


# ------------------------------ JAX wrappers --------------------------------

def _gn_qkv(x_cs, gmap, wq, bq, wk, bk, wv, bv, *, num_groups, eps):
    B, C, S = x_cs.shape
    kern = functools.partial(_gn_qkv_kernel, num_groups=num_groups, eps=eps)
    w_spec = pl.BlockSpec((C, C), lambda b: (0, 0))       # resident across grid
    b_spec = pl.BlockSpec((1, C), lambda b: (0, 0))
    outs = pl.pallas_call(
        kern,
        out_shape=[jax.ShapeDtypeStruct((B, S, C), x_cs.dtype)] * 3,
        grid=(B,),
        in_specs=[
            pl.BlockSpec((1, C, S), lambda b: (b, 0, 0)),
            w_spec,                       # group one-hot map
            w_spec, w_spec, w_spec,       # Wq^T, Wk^T, Wv^T
            b_spec, b_spec, b_spec,       # biases
        ],
        out_specs=[pl.BlockSpec((1, S, C), lambda b: (b, 0, 0))] * 3,
        compiler_params=pltpu.CompilerParams(
            dimension_semantics=("parallel",),
            vmem_limit_bytes=_VMEM_LIMIT),
    )(x_cs, gmap, wq.T, wk.T, wv.T,
      bq.reshape(1, C), bk.reshape(1, C), bv.reshape(1, C))
    return outs  # (q, k, v), each (B, S, C)


def _flash_attention(q, k, v, *, scale):
    B, S, C = q.shape
    tq = _pick_tile(S, (256, 128))
    tk = _pick_tile(S, (256, 128))
    kern = functools.partial(_flash_attn_kernel, scale=scale)
    return pl.pallas_call(
        kern,
        out_shape=jax.ShapeDtypeStruct((B, S, C), q.dtype),
        grid=(B, S // tq, S // tk),
        in_specs=[
            pl.BlockSpec((1, tq, C), lambda b, qi, ki: (b, qi, 0)),
            pl.BlockSpec((1, tk, C), lambda b, qi, ki: (b, ki, 0)),
            pl.BlockSpec((1, tk, C), lambda b, qi, ki: (b, ki, 0)),
        ],
        out_specs=pl.BlockSpec((1, tq, C), lambda b, qi, ki: (b, qi, 0)),
        scratch_shapes=[
            pltpu.VMEM((tq, 1), jnp.float32),   # running max
            pltpu.VMEM((tq, 1), jnp.float32),   # running denom
            pltpu.VMEM((tq, C), jnp.float32),   # output accumulator
        ],
        compiler_params=pltpu.CompilerParams(
            dimension_semantics=("parallel", "parallel", "arbitrary"),
            vmem_limit_bytes=_VMEM_LIMIT),
    )(q, k, v)


def _proj_residual(attn, x_cs, wp, bp):
    B, S, C = attn.shape
    ts = _pick_tile(S, (512, 256, 128))
    return pl.pallas_call(
        _proj_residual_kernel,
        out_shape=jax.ShapeDtypeStruct((B, C, S), x_cs.dtype),
        grid=(B, S // ts),
        in_specs=[
            pl.BlockSpec((1, ts, C), lambda b, si: (b, si, 0)),
            pl.BlockSpec((1, C, ts), lambda b, si: (b, 0, si)),
            pl.BlockSpec((C, C), lambda b, si: (0, 0)),
            pl.BlockSpec((1, C), lambda b, si: (0, 0)),
        ],
        out_specs=pl.BlockSpec((1, C, ts), lambda b, si: (b, 0, si)),
        compiler_params=pltpu.CompilerParams(
            dimension_semantics=("parallel", "parallel"),
            vmem_limit_bytes=_VMEM_LIMIT),
    )(attn, x_cs, wp.T, bp.reshape(1, C))


def attention_block_forward(x, params, *, num_groups=8, eps=1e-5):
    B, C, H, W = x.shape
    assert C % num_groups == 0, "F.group_norm(num_groups=8) requires C % 8 == 0"
    S = H * W
    x_cs = x.reshape(B, C, S)                  # free reshape (no HBM transpose)

    cpg = C // num_groups
    gids = jnp.arange(C) // cpg
    gmap = (gids[:, None] == gids[None, :]).astype(jnp.float32)   # (C, C)

    q, k, v = _gn_qkv(x_cs, gmap,
                      params["wq"], params["bq"],
                      params["wk"], params["bk"],
                      params["wv"], params["bv"],
                      num_groups=num_groups, eps=eps)

    attn = _flash_attention(q, k, v, scale=float(C) ** -0.5)       # (B, S, C)
    out_cs = _proj_residual(attn, x_cs, params["wp"], params["bp"])  # (B, C, S)
    return out_cs.reshape(B, C, H, W)


class AttentionBlock:
    """JAX/Pallas port of the PyTorch AttentionBlock (NCHW in / NCHW out)."""

    def __init__(self, C, *, key=None):
        self.C = C
        if key is None:
            key = jax.random.PRNGKey(0)
        keys = jax.random.split(key, 8)
        bound = 1.0 / float(np.sqrt(C))     # nn.Linear default init

        def lin(kw, kb):
            w = jax.random.uniform(kw, (C, C), jnp.float32, -bound, bound)
            b = jax.random.uniform(kb, (C,), jnp.float32, -bound, bound)
            return w, b

        wq, bq = lin(keys[0], keys[1])
        wk, bk = lin(keys[2], keys[3])
        wv, bv = lin(keys[4], keys[5])
        wp, bp = lin(keys[6], keys[7])
        self.params = dict(wq=wq, bq=bq, wk=wk, bk=bk, wv=wv, bv=bv, wp=wp, bp=bp)

    def __call__(self, x):
        return attention_block_forward(x, self.params)


# --------------------------- pure-JAX reference ------------------------------

def attention_block_ref(x, params, *, num_groups=8, eps=1e-5):
    B, C, H, W = x.shape
    xg = x.reshape(B, num_groups, (C // num_groups) * H * W)
    mean = xg.mean(axis=-1, keepdims=True)
    var = xg.var(axis=-1, keepdims=True)
    hn = ((xg - mean) / jnp.sqrt(var + eps)).reshape(B, C, H, W)
    h = jnp.transpose(hn, (0, 2, 3, 1)).reshape(B, H * W, C)       # (B, S, C)
    q = h @ params["wq"].T + params["bq"]
    k = h @ params["wk"].T + params["bk"]
    v = h @ params["wv"].T + params["bv"]
    w = jnp.einsum("bqc,bkc->bqk", q, k) * (float(C) ** -0.5)
    w = jax.nn.softmax(w, axis=-1)
    a = jnp.einsum("bqk,bkc->bqc", w, v)
    p = a @ params["wp"].T + params["bp"]
    p = jnp.transpose(p.reshape(B, H, W, C), (0, 3, 1, 2))
    return x + p


# ---------------------------------- main ------------------------------------

if __name__ == "__main__":
    key = jax.random.PRNGKey(0)
    k_x, k_p = jax.random.split(key)

    # C must be divisible by 8 (group_norm num_groups=8).
    B, C, H, W = 2, 32, 8, 8
    x = jax.random.normal(k_x, (B, C, H, W), jnp.float32)

    block = AttentionBlock(C, key=k_p)
    y = jax.block_until_ready(block(x))
    assert y.shape == x.shape

    ref = attention_block_ref(x, block.params)
    np.testing.assert_allclose(np.asarray(y), np.asarray(ref), rtol=1e-3, atol=1e-3)

    print("KERNEL_OK")
</pallas_src>

<mosaic_0001>
module attributes {stable_mosaic.version = 11 : i64} {
  func.func @_gn_qkv_kernel(%arg0: i32, %arg1: memref<1x32x64xf32, #tpu.memory_space<vmem>>, %arg2: memref<32x32xf32, #tpu.memory_space<vmem>>, %arg3: memref<32x32xf32, #tpu.memory_space<vmem>>, %arg4: memref<32x32xf32, #tpu.memory_space<vmem>>, %arg5: memref<32x32xf32, #tpu.memory_space<vmem>>, %arg6: memref<1x32xf32, #tpu.memory_space<vmem>>, %arg7: memref<1x32xf32, #tpu.memory_space<vmem>>, %arg8: memref<1x32xf32, #tpu.memory_space<vmem>>, %arg9: memref<1x64x32xf32, #tpu.memory_space<vmem>>, %arg10: memref<1x64x32xf32, #tpu.memory_space<vmem>>, %arg11: memref<1x64x32xf32, #tpu.memory_space<vmem>>) attributes {dimension_semantics = [#tpu.dimension_semantics<parallel>], iteration_bounds = array<i64: 2>, scalar_prefetch = 0 : i64, scratch_operands = 0 : i64, tpu.core_type = #tpu.core_type<tc>, window_params = [{transform_indices = @transform_0, window_bounds = array<i64: 1, 32, 64>}, {pipeline_mode = #tpu.pipeline_mode<synchronous>, transform_indices = @transform_1, window_bounds = array<i64: 32, 32>}, {pipeline_mode = #tpu.pipeline_mode<synchronous>, transform_indices = @transform_2, window_bounds = array<i64: 32, 32>}, {pipeline_mode = #tpu.pipeline_mode<synchronous>, transform_indices = @transform_3, window_bounds = array<i64: 32, 32>}, {pipeline_mode = #tpu.pipeline_mode<synchronous>, transform_indices = @transform_4, window_bounds = array<i64: 32, 32>}, {pipeline_mode = #tpu.pipeline_mode<synchronous>, transform_indices = @transform_5, window_bounds = array<i64: 1, 32>}, {pipeline_mode = #tpu.pipeline_mode<synchronous>, transform_indices = @transform_6, window_bounds = array<i64: 1, 32>}, {pipeline_mode = #tpu.pipeline_mode<synchronous>, transform_indices = @transform_7, window_bounds = array<i64: 1, 32>}, {transform_indices = @transform_8, window_bounds = array<i64: 1, 64, 32>}, {transform_indices = @transform_9, window_bounds = array<i64: 1, 64, 32>}, {transform_indices = @transform_10, window_bounds = array<i64: 1, 64, 32>}]} {
    %c0 = arith.constant 0 : index
    %c0_0 = arith.constant 0 : index
    %c0_1 = arith.constant 0 : index
    %0 = vector.load %arg1[%c0, %c0_0, %c0_1] : memref<1x32x64xf32, #tpu.memory_space<vmem>>, vector<1x32x64xf32>
    %1 = vector.shape_cast %0 : vector<1x32x64xf32> to vector<32x64xf32>
    %2 = tpu.transpose %1, [1, 0] : vector<32x64xf32> -> vector<64x32xf32>
    %cst = arith.constant dense<0.000000e+00> : vector<32xf32>
    %3 = vector.multi_reduction <add>, %2, %cst [0] : vector<64x32xf32> to vector<32xf32>
    %4 = vector.shape_cast %3 : vector<32xf32> to vector<1x32xf32>
    %5 = arith.mulf %2, %2 : vector<64x32xf32>
    %cst_2 = arith.constant dense<0.000000e+00> : vector<32xf32>
    %6 = vector.multi_reduction <add>, %5, %cst_2 [0] : vector<64x32xf32> to vector<32xf32>
    %7 = vector.shape_cast %6 : vector<32xf32> to vector<1x32xf32>
    %c0_3 = arith.constant 0 : index
    %c0_4 = arith.constant 0 : index
    %8 = vector.load %arg2[%c0_3, %c0_4] : memref<32x32xf32, #tpu.memory_space<vmem>>, vector<32x32xf32>
    %cst_5 = arith.constant dense<0.000000e+00> : vector<1x32xf32>
    %9 = tpu.matmul %4, %8, %cst_5 {dimension_numbers = #tpu.dot_dimension_numbers<[1], [0], [0], [1], [0, 0, 1, 1], [], []>, precision = #tpu.contract_precision<fp32>} : vector<1x32xf32>, vector<32x32xf32>, vector<1x32xf32> -> vector<1x32xf32>
    %cst_6 = arith.constant 3.906250e-03 : f32
    %10 = vector.broadcast %cst_6 : f32 to vector<1x32xf32>
    %11 = arith.mulf %9, %10 : vector<1x32xf32>
    %c0_7 = arith.constant 0 : index
    %c0_8 = arith.constant 0 : index
    %12 = vector.load %arg2[%c0_7, %c0_8] : memref<32x32xf32, #tpu.memory_space<vmem>>, vector<32x32xf32>
    %cst_9 = arith.constant dense<0.000000e+00> : vector<1x32xf32>
    %13 = tpu.matmul %7, %12, %cst_9 {dimension_numbers = #tpu.dot_dimension_numbers<[1], [0], [0], [1], [0, 0, 1, 1], [], []>, precision = #tpu.contract_precision<fp32>} : vector<1x32xf32>, vector<32x32xf32>, vector<1x32xf32> -> vector<1x32xf32>
    %cst_10 = arith.constant 3.906250e-03 : f32
    %14 = vector.broadcast %cst_10 : f32 to vector<1x32xf32>
    %15 = arith.mulf %13, %14 : vector<1x32xf32>
    %16 = arith.mulf %11, %11 : vector<1x32xf32>
    %17 = arith.subf %15, %16 : vector<1x32xf32>
    %18 = vector.broadcast %11 : vector<1x32xf32> to vector<64x32xf32>
    %19 = arith.subf %2, %18 : vector<64x32xf32>
    %cst_11 = arith.constant 9.99999974E-6 : f32
    %20 = vector.broadcast %cst_11 : f32 to vector<1x32xf32>
    %21 = arith.addf %17, %20 : vector<1x32xf32>
    %22 = math.rsqrt %21 : vector<1x32xf32>
    %23 = vector.broadcast %22 : vector<1x32xf32> to vector<64x32xf32>
    %24 = arith.mulf %19, %23 : vector<64x32xf32>
    %c0_12 = arith.constant 0 : index
    %c0_13 = arith.constant 0 : index
    %25 = vector.load %arg3[%c0_12, %c0_13] : memref<32x32xf32, #tpu.memory_space<vmem>>, vector<32x32xf32>
    %cst_14 = arith.constant dense<0.000000e+00> : vector<64x32xf32>
    %26 = tpu.matmul %24, %25, %cst_14 {dimension_numbers = #tpu.dot_dimension_numbers<[1], [0], [0], [1], [0, 0, 1, 1], [], []>, precision = #tpu.contract_precision<fp32>} : vector<64x32xf32>, vector<32x32xf32>, vector<64x32xf32> -> vector<64x32xf32>
    %c0_15 = arith.constant 0 : index
    %c0_16 = arith.constant 0 : index
    %27 = vector.load %arg6[%c0_15, %c0_16] : memref<1x32xf32, #tpu.memory_space<vmem>>, vector<1x32xf32>
    %28 = vector.broadcast %27 : vector<1x32xf32> to vector<64x32xf32>
    %29 = arith.addf %26, %28 : vector<64x32xf32>
    %c0_17 = arith.constant 0 : index
    %c0_18 = arith.constant 0 : index
    %c0_19 = arith.constant 0 : index
    %30 = vector.load %arg9[%c0_17, %c0_18, %c0_19] : memref<1x64x32xf32, #tpu.memory_space<vmem>>, vector<1x64x32xf32>
    %31 = vector.shape_cast %30 : vector<1x64x32xf32> to vector<64x32xf32>
    %32 = vector.shape_cast %29 : vector<64x32xf32> to vector<1x64x32xf32>
    tpu.vector_store %arg9[%c0_17, %c0_18, %c0_19], %32 {strides = array<i32>} : memref<1x64x32xf32, #tpu.memory_space<vmem>>, vector<1x64x32xf32>,
    %c0_20 = arith.constant 0 : index
    %c0_21 = arith.constant 0 : index
    %33 = vector.load %arg4[%c0_20, %c0_21] : memref<32x32xf32, #tpu.memory_space<vmem>>, vector<32x32xf32>
    %cst_22 = arith.constant dense<0.000000e+00> : vector<64x32xf32>
    %34 = tpu.matmul %24, %33, %cst_22 {dimension_numbers = #tpu.dot_dimension_numbers<[1], [0], [0], [1], [0, 0, 1, 1], [], []>, precision = #tpu.contract_precision<fp32>} : vector<64x32xf32>, vector<32x32xf32>, vector<64x32xf32> -> vector<64x32xf32>
    %c0_23 = arith.constant 0 : index
    %c0_24 = arith.constant 0 : index
    %35 = vector.load %arg7[%c0_23, %c0_24] : memref<1x32xf32, #tpu.memory_space<vmem>>, vector<1x32xf32>
    %36 = vector.broadcast %35 : vector<1x32xf32> to vector<64x32xf32>
    %37 = arith.addf %34, %36 : vector<64x32xf32>
    %c0_25 = arith.constant 0 : index
    %c0_26 = arith.constant 0 : index
    %c0_27 = arith.constant 0 : index
    %38 = vector.load %arg10[%c0_25, %c0_26, %c0_27] : memref<1x64x32xf32, #tpu.memory_space<vmem>>, vector<1x64x32xf32>
    %39 = vector.shape_cast %38 : vector<1x64x32xf32> to vector<64x32xf32>
    %40 = vector.shape_cast %37 : vector<64x32xf32> to vector<1x64x32xf32>
    tpu.vector_store %arg10[%c0_25, %c0_26, %c0_27], %40 {strides = array<i32>} : memref<1x64x32xf32, #tpu.memory_space<vmem>>, vector<1x64x32xf32>,
    %c0_28 = arith.constant 0 : index
    %c0_29 = arith.constant 0 : index
    %41 = vector.load %arg5[%c0_28, %c0_29] : memref<32x32xf32, #tpu.memory_space<vmem>>, vector<32x32xf32>
    %cst_30 = arith.constant dense<0.000000e+00> : vector<64x32xf32>
    %42 = tpu.matmul %24, %41, %cst_30 {dimension_numbers = #tpu.dot_dimension_numbers<[1], [0], [0], [1], [0, 0, 1, 1], [], []>, precision = #tpu.contract_precision<fp32>} : vector<64x32xf32>, vector<32x32xf32>, vector<64x32xf32> -> vector<64x32xf32>
    %c0_31 = arith.constant 0 : index
    %c0_32 = arith.constant 0 : index
    %43 = vector.load %arg8[%c0_31, %c0_32] : memref<1x32xf32, #tpu.memory_space<vmem>>, vector<1x32xf32>
    %44 = vector.broadcast %43 : vector<1x32xf32> to vector<64x32xf32>
    %45 = arith.addf %42, %44 : vector<64x32xf32>
    %c0_33 = arith.constant 0 : index
    %c0_34 = arith.constant 0 : index
    %c0_35 = arith.constant 0 : index
    %46 = vector.load %arg11[%c0_33, %c0_34, %c0_35] : memref<1x64x32xf32, #tpu.memory_space<vmem>>, vector<1x64x32xf32>
    %47 = vector.shape_cast %46 : vector<1x64x32xf32> to vector<64x32xf32>
    %48 = vector.shape_cast %45 : vector<64x32xf32> to vector<1x64x32xf32>
    tpu.vector_store %arg11[%c0_33, %c0_34, %c0_35], %48 {strides = array<i32>} : memref<1x64x32xf32, #tpu.memory_space<vmem>>, vector<1x64x32xf32>,
    return
  }
  func.func @transform_0(%arg0: i32) -> (i32, i32, i32) {
    %c0_i32 = arith.constant 0 : i32
    %c0_i32_0 = arith.constant 0 : i32
    %c0_i32_1 = arith.constant 0 : i32
    return %arg0, %c0_i32, %c0_i32_0 : i32, i32, i32
  }
  func.func @transform_1(%arg0: i32) -> (i32, i32) {
    %c0_i32 = arith.constant 0 : i32
    %c0_i32_0 = arith.constant 0 : i32
    %c0_i32_1 = arith.constant 0 : i32
    return %c0_i32, %c0_i32_0 : i32, i32
  }
  func.func @transform_2(%arg0: i32) -> (i32, i32) {
    %c0_i32 = arith.constant 0 : i32
    %c0_i32_0 = arith.constant 0 : i32
    %c0_i32_1 = arith.constant 0 : i32
    return %c0_i32, %c0_i32_0 : i32, i32
  }
  func.func @transform_3(%arg0: i32) -> (i32, i32) {
    %c0_i32 = arith.constant 0 : i32
    %c0_i32_0 = arith.constant 0 : i32
    %c0_i32_1 = arith.constant 0 : i32
    return %c0_i32, %c0_i32_0 : i32, i32
  }
  func.func @transform_4(%arg0: i32) -> (i32, i32) {
    %c0_i32 = arith.constant 0 : i32
    %c0_i32_0 = arith.constant 0 : i32
    %c0_i32_1 = arith.constant 0 : i32
    return %c0_i32, %c0_i32_0 : i32, i32
  }
  func.func @transform_5(%arg0: i32) -> (i32, i32) {
    %c0_i32 = arith.constant 0 : i32
    %c0_i32_0 = arith.constant 0 : i32
    %c0_i32_1 = arith.constant 0 : i32
    return %c0_i32, %c0_i32_0 : i32, i32
  }
  func.func @transform_6(%arg0: i32) -> (i32, i32) {
    %c0_i32 = arith.constant 0 : i32
    %c0_i32_0 = arith.constant 0 : i32
    %c0_i32_1 = arith.constant 0 : i32
    return %c0_i32, %c0_i32_0 : i32, i32
  }
  func.func @transform_7(%arg0: i32) -> (i32, i32) {
    %c0_i32 = arith.constant 0 : i32
    %c0_i32_0 = arith.constant 0 : i32
    %c0_i32_1 = arith.constant 0 : i32
    return %c0_i32, %c0_i32_0 : i32, i32
  }
  func.func @transform_8(%arg0: i32) -> (i32, i32, i32) {
    %c0_i32 = arith.constant 0 : i32
    %c0_i32_0 = arith.constant 0 : i32
    %c0_i32_1 = arith.constant 0 : i32
    return %arg0, %c0_i32, %c0_i32_0 : i32, i32, i32
  }
  func.func @transform_9(%arg0: i32) -> (i32, i32, i32) {
    %c0_i32 = arith.constant 0 : i32
    %c0_i32_0 = arith.constant 0 : i32
    %c0_i32_1 = arith.constant 0 : i32
    return %arg0, %c0_i32, %c0_i32_0 : i32, i32, i32
  }
  func.func @transform_10(%arg0: i32) -> (i32, i32, i32) {
    %c0_i32 = arith.constant 0 : i32
    %c0_i32_0 = arith.constant 0 : i32
    %c0_i32_1 = arith.constant 0 : i32
    return %arg0, %c0_i32, %c0_i32_0 : i32, i32, i32
  }
}

</mosaic_0001>

<bundles_post_ra>
// kernel: tpu_custom_call.1
= control target key start
LH: loop header
LB: loop body
LE: loop exit
PB: predicated region body
PF: predicated region fallthrough
CT: control target
= control target key end

     0   :  { %16 = vsyncpa [#allocation3], 0  ;;  %s6302_s0 = inlined_call_operand.hbm [shape: f32[2,32,64], index: 0, kind: input, shape index: {}]   ;;  %s6303_s1 = inlined_call_operand.hbm [shape: f32[32,32], index: 1, kind: input, shape index: {}]   ;;  %s6304_s2 = inlined_call_operand.hbm [shape: f32[32,32], index: 2, kind: input, shape index: {}]   ;;  %s6305_s3 = inlined_call_operand.hbm [shape: f32[32,32], index: 3, kind: input, shape index: {}]   ;;  %s6306_s4 = inlined_call_operand.hbm [shape: f32[32,32], index: 4, kind: input, shape index: {}]   ;;  %s6307_s5 = inlined_call_operand.vmem [shape: f32[1,32], index: 5, kind: input, shape index: {}]   ;;  %s6308_s6 = inlined_call_operand.vmem [shape: f32[1,32], index: 6, kind: input, shape index: {}]   ;;  %s6309_s7 = inlined_call_operand.vmem [shape: f32[1,32], index: 7, kind: input, shape index: {}]   ;;  %s6310_s8 = inlined_call_operand.vmem [shape: f32[2,64,32], index: 8, kind: output, shape index: {0}]   ;;  %s6311_s9 = inlined_call_operand.vmem [shape: f32[2,64,32], index: 9, kind: output, shape index: {1}]   ;;  %s6312_s10 = inlined_call_operand.vmem [shape: f32[2,64,32], index: 10, kind: output, shape index: {2}]  }
   0x1   :  { %18 = vsyncpa [#allocation3 + $0x1], 0 }
   0x2   :  { %19 = vsyncpa [#allocation5], 0 }
   0x3   :  { %20 = vsyncpa [#allocation8], 0  ;;  %s5295_s13 = smov 0   ;;  %s5297_s14 = smov 0  }
   0x4   :  { %s5299_s15 = smov 0   ;;  %s5301_s16 = smov 0  }
   0x5 LB: > { %s5314_s17 = sadd.s32 4294967295, %s5229_s16   ;;  %p46_p0 = scmp.ne.s32.totalorder %s5221_s14, %s5217_s13  ;;  %s5229_s16 = sphi %s5301_s16, %s6333_s16   ;;  %s5225_s15 = sphi %s5299_s15, %s6332_s15   ;;  %s5221_s14 = sphi %s5297_s14, %s6331_s14   ;;  %s5217_s13 = sphi %s5295_s13, %s6330_s13  }
   0x6   : > { %p6315_p1 = scmp.eq.s32.totalorder %s5314_s17, 0  ;;  %p4171_p2 = scmp.ge.s32.totalorder %s5229_s16, 1 }
   0x7   : > { %p282_p3 = scmp.lt.s32.totalorder %s5229_s16, 3  ;;  %s5231_s20 = smov [#allocation4]  }
   0x8   : > { %p5322_p4 = por %p6315_p1, %p46_p0  ;;  %s294_s21 = sshll.u32 %s5231_s20, 4  ;;  %s295_s21 = int_to_ptr.vmem [resolvable:$true] %s294_s21 }
   0x9   : > { %p5326_p5 = pnand %p4171_p2, %p282_p3  ;;  %s5232_s23 = smov [#allocation7]  }
   0xa   : > { %s6318_s18 = scalar_select %p5322_p4, 1, 0 }
   0xb   : > { %s6319_s19 = scalar_select %p5326_p5, 1, 0 }
   0xc   : > { %p4987_p6 = pneg %p5326_p5  ;;  %s320_s24 = sshll.u32 %s5232_s23, 4  ;;  %s321_s24 = int_to_ptr.vmem [resolvable:$true] %s320_s24 }
   0xd   : > { %s5233_s25 = smov [#allocation6]   ;;  %s5066_s27 = scalar_lea.vmem %s295_s21, 512 }
   0xe   : > { %p5334_p7 = pnand %p4987_p6, %p6315_p1  ;;  %s307_s26 = sshll.u32 %s5233_s25, 4  ;;  %s308_s26 = int_to_ptr.vmem [resolvable:$true] %s307_s26 }
   0xf   : > { %p5067_p9 = scmp.ne.s32.totalorder %s295_s21, %s5066_s27  ;;  %p5074_p12 = scmp.lt.s32.totalorder %s295_s21, %s295_s21 }
  0x10   : > { %p5057_p8 = pneg %p5334_p7  ;;  %p5075_p13 = scmp.lt.s32.totalorder %s5066_s27, %s5066_s27 }
  0x12   : > { %p5069_p10 = pnand %p5067_p9, %p5057_p8  ;;  %p5076_p0 = por %p5075_p13, %p5074_p12 }
  0x14   : > { %p5070_p11 = pneg %p5069_p10 }
  0x16   : > { %p5077_p2 = pnand %p5076_p0, %p5070_p11 }
  0x18   : > { %5080 = shalt.err (!%p5077_p2)
}
  0x19   : > { %s6313_s28 = smov 128   ;;  %s6314_s29 = smov 8  }
  0x1a   : > { %4990 = dma.hbm_to_vmem [thread:$0]  (!%p5334_p7), %s6303_s1, 512, %s295_s21, [#allocation5], %s6313_s28, %s6313_s28, %s6314_s29  }
  0x1b   : > { %s5092_s12 = scalar_lea.vmem %s321_s24, 512  ;;  %p5100_p10 = scmp.lt.s32.totalorder %s321_s24, %s321_s24 }
  0x1c   : > { %p5093_p3 = scmp.ne.s32.totalorder %s321_s24, %s5092_s12  ;;  %p5101_p11 = scmp.lt.s32.totalorder %s5092_s12, %s5092_s12 }
  0x1e   : > { %p5095_p6 = pnand %p5093_p3, %p5057_p8  ;;  %p5102_p12 = por %p5101_p11, %p5100_p10 }
  0x20   : > { %p5096_p9 = pneg %p5095_p6 }
  0x22   : > { %p5103_p13 = pnand %p5102_p12, %p5096_p9 }
  0x24   : > { %5106 = shalt.err (!%p5103_p13)
}
  0x25   : > { %4996 = dma.hbm_to_vmem [thread:$0]  (!%p5334_p7), %s6305_s3, 512, %s321_s24, [#allocation8], %s6313_s28, %s6313_s28, %s6314_s29  }
  0x26   : > { %s5118_s21 = scalar_lea.vmem %s308_s26, 512  ;;  %p5126_p6 = scmp.lt.s32.totalorder %s308_s26, %s308_s26 }
  0x27   : > { %p5119_p0 = scmp.ne.s32.totalorder %s308_s26, %s5118_s21  ;;  %p5127_p9 = scmp.lt.s32.totalorder %s5118_s21, %s5118_s21 }
  0x29   : > { %p5121_p2 = pnand %p5119_p0, %p5057_p8  ;;  %p5128_p10 = por %p5127_p9, %p5126_p6 }
  0x2b   : > { %p5122_p3 = pneg %p5121_p2 }
  0x2d   : > { %p5129_p11 = pnand %p5128_p10, %p5122_p3 }
  0x2f   : > { %5132 = shalt.err (!%p5129_p11)
}
  0x30   : > { %4993 = dma.hbm_to_vmem [thread:$0]  (!%p5334_p7), %s6304_s2, 512, %s308_s26, [#allocation5], %s6313_s28, %s6313_s28, %s6314_s29  }
  0x31   : > { %s5236_s24 = smov [#allocation9]  }
  0x32   : > { %s333_s27 = sshll.u32 %s5236_s24, 4  ;;  %s334_s27 = int_to_ptr.vmem [resolvable:$true] %s333_s27 }
  0x33   : > { %s5144_s30 = scalar_lea.vmem %s334_s27, 512  ;;  %p5152_p2 = scmp.lt.s32.totalorder %s334_s27, %s334_s27 }
  0x34   : > { %p5145_p12 = scmp.ne.s32.totalorder %s334_s27, %s5144_s30  ;;  %p5153_p3 = scmp.lt.s32.totalorder %s5144_s30, %s5144_s30 }
  0x36   : > { %p5147_p13 = pnand %p5145_p12, %p5057_p8  ;;  %p5154_p6 = por %p5153_p3, %p5152_p2 }
  0x38   : > { %p5148_p0 = pneg %p5147_p13 }
  0x3a   : > { %p5155_p9 = pnand %p5154_p6, %p5148_p0 }
  0x3c   : > { %5158 = shalt.err (!%p5155_p9)
}
  0x3d   : > { %4999 = dma.hbm_to_vmem [thread:$0]  (!%p5334_p7), %s6306_s4, 512, %s334_s27, [#allocation8], %s6313_s28, %s6313_s28, %s6314_s29  }
  0x3e   : > { %s5385_s12 = sadd.s32 1, %s5229_s16   ;;  %s33_s22 = sadd.s32 1, %s5225_s15 }
  0x3f   : > { %s30_s13 = ssub.s32 %s5229_s16, %s5385_s12  ;;  %p40_p8 = scmp.ne.s32.totalorder %s5225_s15, %s5221_s14 }
  0x40   : > { %p31_p10 = scmp.eq.s32.totalorder %s30_s13, 0  ;;  %p41_p11 = scmp.eq.s32.totalorder %s5229_s16, 0 }
  0x41   : > { %p5008_p12 = scmp.lt.s32.totalorder %s5229_s16, 2  ;;  %s356_s20 = sand.u32 1, %s5225_s15  }
  0x42   : > { %s5396_s21 = scalar_select %p31_p10, %s5225_s15, %s33_s22  }
  0x43   : > { %p42_p13 = por %p41_p11, %p40_p8  ;;  %s4177_s23 = sshll.u32 %s356_s20, 5 }
  0x44   : > { %s4197_s25 = sshll.u32 %s5229_s16, 9  ;;  %s360_s27 = scalar_lea.vmem [#allocation2], %s4177_s23 }
  0x45   : > { %s5402_s26 = scalar_lea.hbm %s6302_s0, %s4197_s25  ;;  %s367_s11 = sshll.u32 %s360_s27, 4  ;;  %s5408_s11 = int_to_ptr.vmem [resolvable:$true] %s367_s11 }
  0x46   : > { %p5404_p7 = pnand %p5008_p12, %p42_p13  ;;  %s5410_s22 = scalar_lea.sflag [#allocation3], %s356_s20 }
  0x47   : > { %s5159_s16 = scalar_lea.hbm %s5402_s26, 512  ;;  %s5164_s23 = scalar_lea.hbm %s6302_s0, 1024 }
  0x48   : > { %p5160_p0 = scmp.ne.s32.totalorder %s5402_s26, %s5159_s16  ;;  %p5161_p2 = pneg %p5404_p7 }
  0x49   : > { %p5165_p9 = scmp.lt.s32.totalorder %s5402_s26, %s6302_s0  ;;  %p5166_p8 = scmp.lt.s32.totalorder %s5164_s23, %s5159_s16 }
  0x4a   : > { %p5162_p3 = pnand %p5161_p2, %p5160_p0 }
  0x4b   : > { %p5167_p10 = por %p5166_p8, %p5165_p9 }
  0x4c   : > { %p5163_p6 = pneg %p5162_p3 }
  0x4e   : > { %p5168_p11 = pnand %p5167_p10, %p5163_p6 }
  0x50   : > { %5171 = shalt.err (!%p5168_p11)
}
  0x51   : > { %s5172_s20 = scalar_lea.vmem %s5408_s11, 512  ;;  %s5237_s28 = smov [#allocation2]  }
  0x52   : > { %p5173_p12 = scmp.ne.s32.totalorder %s5408_s11, %s5172_s20  ;;  %s5177_s29 = sshll.u32 %s5237_s28, 4  ;;  %s5178_s29 = int_to_ptr.vmem [resolvable:$false] %s5177_s29 }
  0x53   : > { %s5179_s25 = scalar_lea.vmem %s5178_s29, 1024  ;;  %p5180_p3 = scmp.lt.s32.totalorder %s5408_s11, %s5178_s29 }
  0x54   : > { %p5175_p13 = pnand %p5173_p12, %p5161_p2  ;;  %p5181_p1 = scmp.lt.s32.totalorder %s5179_s25, %s5172_s20 }
  0x56   : > { %p5176_p0 = pneg %p5175_p13  ;;  %p5182_p4 = por %p5181_p1, %p5180_p3 }
  0x58   : > { %p5183_p5 = pnand %p5182_p4, %p5176_p0 }
  0x5a   : > { %5186 = shalt.err (!%p5183_p5)
}
  0x5b   : > { %s6322_s16 = smov 8   ;;  %s6323_s24 = smov 128  }
  0x5c   : > { %5003 = dma.hbm_to_vmem [thread:$0]  (!%p5404_p7), %s5402_s26, 512, %s5408_s11, %s5410_s22, %s6323_s24, %s6323_s24, %s6322_s16  }
  0x5d   : > { %p6324_p2 = scmp.ne.s32.totalorder %s6319_s19, 0 }
  0x5e   : > { %s381_s28 = sand.u32 (!%p6324_p2), 1, %s5221_s14   ;;  %p6325_p1 = scmp.ne.s32.totalorder (!%p6324_p2), %s6318_s18, 0 }
  0x5f   : > { %379 = sbr.rel (%p6324_p2) target bundleno = 908 (0x38c), region = 52  ;;  %s4181_s29 = sshll.u32 (!%p6324_p2), %s381_s28, 5 }
  0x60   : > { %s382_s23 = scalar_lea.sflag (!%p6324_p2), [#allocation3], %s381_s28  ;;  %s385_s30 = scalar_lea.vmem (!%p6324_p2), [#allocation2], %s4181_s29 }
  0x64   : > { %5204 = dma.done.wait (%p6325_p1), %s382_s23, 512  }
  0x65   : > { %5206 = vsyncadd (%p6325_p1), %s382_s23, 4294966784  ;;  %p6326_p4 = scmp.eq.s32.totalorder %s5314_s17, 0 }
  0x67   : > { %5208 = dma.done.wait (%p6326_p4), [#allocation5], 1024   ;;  %p6327_p5 = pmov %p6326_p4 }
  0x68   : > { %p6328_p7 = pmov %p6326_p4 }
  0x69   : > { %5210 = vsyncadd (%p6327_p5), [#allocation5], 4294966272 }
  0x6a   : > { %5212 = dma.done.wait (%p6328_p7), [#allocation8], 1024   ;;  %p6329_p6 = pmov %p6326_p4 }
  0x6b   : > { %v463_v0 = vld [vmem:[%s385_s30] sm:$0xff]  ;;  %v464_v1 = vld [vmem:[%s385_s30 + $0x8] sm:$0xff]  ;;  %v465_v2 = vld [vmem:[%s385_s30 + $0x10] sm:$0xff]  ;;  %v5238_v21 = vmov 0.0   ;;  %vm5239_vm0 = vmmov 0   ;;  %vm499_vm1 = vcmask 261120  }
  0x6c   : > { %5214 = vsyncadd (%p6329_p6), [#allocation8], 4294966272  ;;  %467 = vxpose.xlu0.b32.start [1/4] (short) (narrow) %v463_v0, 64  ;;  %v466_v3 = vld [vmem:[%s385_s30 + $0x18] sm:$0xff]  ;;  %v552_v6 = vld [vmem:[#allocation4 + $0x10] sm:$0xff]  ;;  %4488 = vmatprep.subr.mxu1 %v5238_v21  ;;  %p448_p9 = scmp.lt.s32.totalorder %s5314_s17, 1 }
  0x6d   : > { %v553_v4 = vld [vmem:[#allocation4 + $0x18] sm:$0xff]  ;;  %v5454_v8 = vand.u32 4294901760, %v552_v6  ;;  %v551_v9 = vld [vmem:[#allocation4 + $0x8] sm:$0xff]  ;;  %v550_v13 = vld [vmem:[#allocation4] sm:$0xff]  ;;  %4477 = vmatprep.subr.mxu0 %v5238_v21  ;;  %4496 = vmatprep.mubr.msk.f32.mxu1 %vm5239_vm0, %v5238_v21 }
  0x6e   : > { %v5449_v5 = vand.u32 4294901760, %v553_v4  ;;  %v5462_v12 = vand.u32 4294901760, %v551_v9  ;;  %v5472_v17 = vand.u32 4294901760, %v550_v13  ;;  %4485 = vmatprep.mubr.msk.f32.mxu0 %vm5239_vm0, %v5238_v21  ;;  %s6335_s17 = smov (!%p448_p9, %s5314_s17), 1 }
  0x6f   : > { %v5460_v11 = vsub.f32 %v552_v6, %v5454_v8  ;;  %s6192_s26 = sshll.u32 %s6335_s17, 6 }
  0x70   : > { %468 = vxpose.xlu0.b32.cont [2/4] (short) (narrow) %v464_v1, 64  ;;  %v5452_v7 = vsub.f32 %v553_v4, %v5449_v5  ;;  %v5470_v16 = vsub.f32 %v551_v9, %v5462_v12  ;;  %v5483_v22 = vsub.f32 %v550_v13, %v5472_v17  ;;  %4478 = vmatpush3.msra.mxu0 %v5449_v5  ;;  %s6198_s22 = scalar_lea.vmem %s6310_s8, %s6192_s26  ;;  %s6236_s16 = scalar_lea.vmem %s6311_s9, %s6192_s26 }
  0x71   : > { %v5467_v15 = vand.u32 4294901760, %v5460_v11  ;;  %4479 = vmatprep.subr.mxu0 %v5238_v21  ;;  %s6269_s30 = scalar_lea.vmem %s6312_s10, %s6192_s26 }
  0x72   : > { %v5457_v10 = vand.u32 4294901760, %v5452_v7  ;;  %v5479_v20 = vand.u32 4294901760, %v5470_v16  ;;  %v5494_v25 = vand.u32 4294901760, %v5483_v22  ;;  %4480 = vmatpush3.msra.mxu0 %v5454_v8 }
  0x73   : > { %v671_v19 = vsub.f32 %v5460_v11, %v5467_v15  ;;  %4481 = vmatprep.subr.mxu0 %v5238_v21 }
  0x74   : > { %469 = vxpose.xlu0.b32.cont [3/4] (short) (narrow) %v465_v2, 64  ;;  %v664_v14 = vsub.f32 %v5452_v7, %v5457_v10  ;;  %v678_v24 = vsub.f32 %v5470_v16, %v5479_v20  ;;  %v685_v27 = vsub.f32 %v5483_v22, %v5494_v25  ;;  %4482 = vmatpush3.msra.mxu0 %v5462_v12 }
  0x75   : > { %v5487_v23 = vand.u32 4294901760, %v671_v19  ;;  %4483 = vmatprep.subr.mxu0 %v5238_v21 }
  0x76   : > { %v5474_v18 = vand.u32 4294901760, %v664_v14  ;;  %v5498_v26 = vand.u32 4294901760, %v678_v24  ;;  %v5509_v28 = vand.u32 4294901760, %v685_v27  ;;  %4484 = vmatpush3.msra.mxu0 %v5472_v17 }
  0x77   : > { %4499 = vmatprep.subr.mxu0 %v5238_v21 }
  0x78   : > { %470 = vxpose.xlu0.b32.end [4/4] (short) (narrow) %v466_v3, 64  ;;  %4489 = vmatpush3.msra.mxu1 %v5474_v18 }
  0x79   : > { %4490 = vmatprep.subr.mxu1 %v5238_v21 }
  0x7a   : > { %4491 = vmatpush3.msra.mxu1 %v5487_v23 }
  0x7b   : > { %4492 = vmatprep.subr.mxu1 %v5238_v21 }
  0x7c   : > { %4493 = vmatpush3.msra.mxu1 %v5498_v26 }
  0x7d   : > { %4494 = vmatprep.subr.mxu1 %v5238_v21 }
  0x7e   : > { %4495 = vmatpush3.msra.mxu1 %v5509_v28 }
  0x7f   : > { %4510 = vmatprep.subr.mxu1 %v5238_v21 }
  0xe8   : > { %v5519_v29 = vpop.trf.xlu0 }
  0xe9   : > { %v500_v36 = vsel %vm499_vm1, %v5519_v29, 0.0  ;;  %v521_v38 = vmul.f32 %v5519_v29, %v5519_v29 }
  0xeb   : > { %v529_v47 = vsel %vm499_vm1, %v521_v38, 0.0 }
  0xec   : > { %v5521_v30 = vpop.trf.xlu0 }
  0xed   : > { %v501_v33 = vsel %vm499_vm1, %v5521_v30, 0.0  ;;  %v522_v34 = vmul.f32 %v5521_v30, %v5521_v30 }
  0xee   : > { %v502_v39 = vadd.f32 %v501_v33, %v500_v36 }
  0xef   : > { %v530_v42 = vsel %vm499_vm1, %v522_v34, 0.0 }
  0xf0   : > { %v5523_v31 = vpop.trf.xlu0  ;;  %v531_v51 = vadd.f32 %v530_v42, %v529_v47 }
  0xf1   : > { %v503_v37 = vsel %vm499_vm1, %v5523_v31, 0.0  ;;  %v523_v40 = vmul.f32 %v5523_v31, %v5523_v31 }
  0xf2   : > { %v504_v43 = vadd.f32 %v503_v37, %v502_v39 }
  0xf3   : > { %v532_v48 = vsel %vm499_vm1, %v523_v40, 0.0 }
  0xf4   : > { %v5525_v32 = vpop.trf.xlu0  ;;  %v533_v57 = vadd.f32 %v532_v48, %v531_v51 }
  0xf5   : > { %v505_v41 = vsel %vm499_vm1, %v5525_v32, 0.0  ;;  %v524_v44 = vmul.f32 %v5525_v32, %v5525_v32 }
  0xf6   : > { %v506_v49 = vadd.f32 %v505_v41, %v504_v43 }
  0xf7   : > { %v534_v53 = vsel %vm499_vm1, %v524_v44, 0.0 }
  0xf8   : > { %v5531_v35 = vpop.trf.xlu0  ;;  %v535_v62 = vadd.f32 %v534_v53, %v533_v57 }
  0xf9   : > { %v507_v46 = vsel %vm499_vm1, %v5531_v35, 0.0  ;;  %v525_v50 = vmul.f32 %v5531_v35, %v5531_v35 }
  0xfa   : > { %v508_v54 = vadd.f32 %v507_v46, %v506_v49 }
  0xfb   : > { %v536_v59 = vsel %vm499_vm1, %v525_v50, 0.0 }
  0xfc   : > { %v5546_v45 = vpop.trf.xlu0  ;;  %v537_v2 = vadd.f32 %v536_v59, %v535_v62 }
  0xfd   : > { %v509_v52 = vsel %vm499_vm1, %v5546_v45, 0.0  ;;  %v526_v55 = vmul.f32 %v5546_v45, %v5546_v45 }
  0xfe   : > { %v510_v60 = vadd.f32 %v509_v52, %v508_v54 }
  0xff   : > { %v538_v63 = vsel %vm499_vm1, %v526_v55, 0.0 }
 0x100   : > { %v5559_v56 = vpop.trf.xlu0  ;;  %v539_v13 = vadd.f32 %v538_v63, %v537_v2 }
 0x101   : > { %v511_v58 = vsel %vm499_vm1, %v5559_v56, 0.0  ;;  %v527_v61 = vmul.f32 %v5559_v56, %v5559_v56 }
 0x102   : > { %v512_v0 = vadd.f32 %v511_v58, %v510_v60 }
 0x103   : > { %v540_v6 = vsel %vm499_vm1, %v527_v61, 0.0 }
 0x104   : > { %v5567_v1 = vpop.trf.xlu0  ;;  %v541_v24 = vadd.f32 %v540_v6, %v539_v13 }
 0x105   : > { %v513_v3 = vsel %vm499_vm1, %v5567_v1, 0.0  ;;  %v528_v4 = vmul.f32 %v5567_v1, %v5567_v1 }
 0x106   : > { %v514_v9 = vadd.f32 %v513_v3, %v512_v0 }
 0x107   : > { %v542_v19 = vsel %vm499_vm1, %v528_v4, 0.0 }
 0x108   : > { %v515_v14 = vrot.slane %v514_v9, 4  ;;  %v543_v33 = vadd.f32 %v542_v19, %v541_v24 }
 0x10a   : > { %v516_v27 = vadd.f32 %v515_v14, %v514_v9  ;;  %v544_v37 = vrot.slane %v543_v33, 4 }
 0x10c   : > { %v517_v34 = vrot.slane %v516_v27, 2  ;;  %v545_v40 = vadd.f32 %v544_v37, %v543_v33 }
 0x10e   : > { %v518_v36 = vadd.f32 %v517_v34, %v516_v27  ;;  %v546_v43 = vrot.slane %v545_v40, 2 }
 0x110   : > { %v519_v38 = vrot.slane %v518_v36, 1  ;;  %v547_v47 = vadd.f32 %v546_v43, %v545_v40 }
 0x112   : > { %v520_v39 = vadd.f32 %v519_v38, %v518_v36  ;;  %v548_v50 = vrot.slane %v547_v47, 1 }
 0x114   : > { %v555_v41 = vsel %vm499_vm1, %v520_v39, 0  ;;  %v549_v51 = vadd.f32 %v548_v50, %v547_v47 }
 0x115   : > { %v626_v42 = vand.u32 4294901760, %v555_v41 }
 0x116   : > { %v1044_v52 = vsel %vm499_vm1, %v549_v51, 0 }
 0x117   : > { %v627_v44 = vsub.f32 %v555_v41, %v626_v42  ;;  %4497 = vmatmul.mubr.f32.vlgmr.msra.gmra.mxu1 %v626_v42  ;;  %v5608_v53 = vand.u32 4294901760, %v1044_v52 }
 0x118   : > { %4511 = vmatpush3.msra.mxu1 %v5449_v5  ;;  %4518 = vmatprep.mubr.msk.f32.mxu1 %vm5239_vm0, %v5238_v21 }
 0x119   : > { %4512 = vmatprep.subr.mxu1 %v5238_v21  ;;  %v628_v46 = vand.u32 4294901760, %v627_v44  ;;  %v1116_v54 = vsub.f32 %v1044_v52, %v5608_v53 }
 0x11a   : > { %4513 = vmatpush3.msra.mxu1 %v5454_v8 }
 0x11b   : > { %4514 = vmatprep.subr.mxu1 %v5238_v21  ;;  %v629_v48 = vsub.f32 %v627_v44, %v628_v46 }
 0x11c   : > { %4515 = vmatpush3.msra.mxu1 %v5462_v12 }
 0x11d   : > { %4516 = vmatprep.subr.mxu1 %v5238_v21  ;;  %v630_v49 = vand.u32 4294901760, %v629_v48 }
 0x11e   : > { %4517 = vmatpush3.msra.mxu1 %v5472_v17 }
 0x11f   : > { %4519 = vmatmul.mubr.f32.vlgmr.msra.gmra.mxu1 %v628_v46  ;;  %4532 = vmatprep.subr.mxu1 %v5238_v21 }
 0x120   : > { %4486 = vmatmul.mubr.f32.vlgmr.msra.gmra.mxu0 %v630_v49  ;;  %4533 = vmatpush3.msra.mxu1 %v5449_v5 }
 0x121   : > { %4500 = vmatpush3.msra.mxu0 %v5452_v7  ;;  %4534 = vmatprep.subr.mxu1 %v5238_v21 }
 0x122   : > { %4501 = vmatprep.subr.mxu0 %v5238_v21  ;;  %4535 = vmatpush3.msra.mxu1 %v5454_v8 }
 0x123   : > { %4502 = vmatpush3.msra.mxu0 %v5460_v11  ;;  %4536 = vmatprep.subr.mxu1 %v5238_v21 }
 0x124   : > { %4503 = vmatprep.subr.mxu0 %v5238_v21  ;;  %4537 = vmatpush3.msra.mxu1 %v5462_v12 }
 0x125   : > { %4504 = vmatpush3.msra.mxu0 %v5470_v16  ;;  %4538 = vmatprep.subr.mxu1 %v5238_v21 }
 0x126   : > { %4505 = vmatprep.subr.mxu0 %v5238_v21  ;;  %4507 = vmatprep.mubr.msk.f32.mxu0 %vm5239_vm0, %v5238_v21 }
 0x127   : > { %4506 = vmatpush3.msra.mxu0 %v5483_v22  ;;  %4539 = vmatpush3.msra.mxu1 %v5472_v17 }
 0x128   : > { %4540 = vmatprep.mubr.msk.f32.mxu1 %vm5239_vm0, %v5238_v21  ;;  %4508 = vmatmul.mubr.f32.vlgmr.msra.gmra.mxu0 %v627_v44 }
 0x129   : > { %4521 = vmatprep.subr.mxu0 %v5238_v21  ;;  %4541 = vmatmul.mubr.f32.vlgmr.msra.gmra.mxu1 %v626_v42 }
 0x12a   : > { %4554 = vmatprep.subr.mxu1 %v5238_v21  ;;  %4522 = vmatpush3.msra.mxu0 %v5457_v10 }
 0x12b   : > { %4555 = vmatpush3.msra.mxu1 %v5474_v18  ;;  %4523 = vmatprep.subr.mxu0 %v5238_v21  ;;  %v1117_v18 = vand.u32 4294901760, %v1116_v54 }
 0x12c   : > { %4556 = vmatprep.subr.mxu1 %v5238_v21  ;;  %4524 = vmatpush3.msra.mxu0 %v5467_v15 }
 0x12d   : > { %4557 = vmatpush3.msra.mxu1 %v5487_v23  ;;  %4525 = vmatprep.subr.mxu0 %v5238_v21  ;;  %v1118_v23 = vsub.f32 %v1116_v54, %v1117_v18 }
 0x12e   : > { %4558 = vmatprep.subr.mxu1 %v5238_v21  ;;  %4526 = vmatpush3.msra.mxu0 %v5479_v20 }
 0x12f   : > { %4559 = vmatpush3.msra.mxu1 %v5498_v26  ;;  %4527 = vmatprep.subr.mxu0 %v5238_v21  ;;  %v1119_v26 = vand.u32 4294901760, %v1118_v23 }
 0x130   : > { %4560 = vmatprep.subr.mxu1 %v5238_v21  ;;  %4528 = vmatpush3.msra.mxu0 %v5494_v25 }
 0x131   : > { %4529 = vmatprep.mubr.msk.f32.mxu0 %vm5239_vm0, %v5238_v21  ;;  %4561 = vmatpush3.msra.mxu1 %v5509_v28 }
 0x132   : > { %4562 = vmatprep.mubr.msk.f32.mxu1 %vm5239_vm0, %v5238_v21  ;;  %4530 = vmatmul.mubr.f32.vlgmr.msra.gmra.mxu0 %v626_v42 }
 0x133   : > { %4543 = vmatprep.subr.mxu0 %v5238_v21  ;;  %4563 = vmatmul.mubr.f32.vlgmr.msra.gmra.mxu1 %v5608_v53 }
 0x134   : > { %4576 = vmatprep.subr.mxu1 %v5238_v21  ;;  %4544 = vmatpush3.msra.mxu0 %v5449_v5 }
 0x135   : > { %4577 = vmatpush3.msra.mxu1 %v5449_v5  ;;  %4545 = vmatprep.subr.mxu0 %v5238_v21 }
 0x136   : > { %4578 = vmatprep.subr.mxu1 %v5238_v21  ;;  %4546 = vmatpush3.msra.mxu0 %v5454_v8 }
 0x137   : > { %4579 = vmatpush3.msra.mxu1 %v5454_v8  ;;  %4547 = vmatprep.subr.mxu0 %v5238_v21 }
 0x138   : > { %4580 = vmatprep.subr.mxu1 %v5238_v21  ;;  %4548 = vmatpush3.msra.mxu0 %v5462_v12 }
 0x139   : > { %4581 = vmatpush3.msra.mxu1 %v5462_v12  ;;  %4549 = vmatprep.subr.mxu0 %v5238_v21 }
 0x13a   : > { %4582 = vmatprep.subr.mxu1 %v5238_v21  ;;  %4550 = vmatpush3.msra.mxu0 %v5472_v17 }
 0x13b   : > { %4551 = vmatprep.mubr.msk.f32.mxu0 %vm5239_vm0, %v5238_v21  ;;  %4583 = vmatpush3.msra.mxu1 %v5472_v17 }
 0x13c   : > { %4584 = vmatprep.mubr.msk.f32.mxu1 %vm5239_vm0, %v5238_v21  ;;  %4552 = vmatmul.mubr.f32.vlgmr.msra.gmra.mxu0 %v1119_v26 }
 0x13d   : > { %4565 = vmatprep.subr.mxu0 %v5238_v21  ;;  %4585 = vmatmul.mubr.f32.vlgmr.msra.gmra.mxu1 %v1117_v18 }
 0x13e   : > { %4598 = vmatprep.subr.mxu1 %v5238_v21  ;;  %4566 = vmatpush3.msra.mxu0 %v5452_v7 }
 0x13f   : > { %4599 = vmatpush3.msra.mxu1 %v5449_v5  ;;  %4567 = vmatprep.subr.mxu0 %v5238_v21  ;;  %v1563_v5 = vld [vmem:[#allocation6 + $0x18] sm:$0xff] }
 0x140   : > { %4600 = vmatprep.subr.mxu1 %v5238_v21  ;;  %4568 = vmatpush3.msra.mxu0 %v5460_v11  ;;  %v5681_v7 = vand.u32 4294901760, %v1563_v5 }
 0x141   : > { %4601 = vmatpush3.msra.mxu1 %v5454_v8  ;;  %4569 = vmatprep.subr.mxu0 %v5238_v21  ;;  %v1562_v8 = vld [vmem:[#allocation6 + $0x10] sm:$0xff] }
 0x142   : > { %4602 = vmatprep.subr.mxu1 %v5238_v21  ;;  %4570 = vmatpush3.msra.mxu0 %v5470_v16  ;;  %v5686_v11 = vand.u32 4294901760, %v1562_v8 }
 0x143   : > { %4603 = vmatpush3.msra.mxu1 %v5462_v12  ;;  %4571 = vmatprep.subr.mxu0 %v5238_v21  ;;  %v1561_v12 = vld [vmem:[#allocation6 + $0x8] sm:$0xff] }
 0x144   : > { %4604 = vmatprep.subr.mxu1 %v5238_v21  ;;  %4572 = vmatpush3.msra.mxu0 %v5483_v22  ;;  %v5694_v16 = vsub.f32 %v1562_v8, %v5686_v11 }
 0x145   : > { %4573 = vmatprep.mubr.msk.f32.mxu0 %vm5239_vm0, %v5238_v21  ;;  %4605 = vmatpush3.msra.mxu1 %v5472_v17  ;;  %v5696_v17 = vand.u32 4294901760, %v1561_v12 }
 0x146   : > { %4606 = vmatprep.mubr.msk.f32.mxu1 %vm5239_vm0, %v5238_v21  ;;  %4574 = vmatmul.mubr.f32.vlgmr.msra.gmra.mxu0 %v1116_v54  ;;  %v5703_v22 = vand.u32 4294901760, %v5694_v16 }
 0x147   : > { %4587 = vmatprep.subr.mxu0 %v5238_v21  ;;  %4607 = vmatmul.mubr.f32.vlgmr.msra.gmra.mxu1 %v5608_v53 }
 0x148   : > { %4588 = vmatpush3.msra.mxu0 %v5457_v10  ;;  %4595 = vmatprep.mubr.msk.f32.mxu0 %vm5239_vm0, %v5238_v21  ;;  %v5684_v10 = vsub.f32 %v1563_v5, %v5681_v7  ;;  %v1779_v57 = vsub.f32 %v5694_v16, %v5703_v22 }
 0x149   : > { %4589 = vmatprep.subr.mxu0 %v5238_v21 }
 0x14a   : > { %4590 = vmatpush3.msra.mxu0 %v5467_v15  ;;  %v5691_v15 = vand.u32 4294901760, %v5684_v10  ;;  %v1780_v60 = vand.u32 4294901760, %v1779_v57  ;;  %v1534_v57 = vlaneseq }
 0x14b   : > { %4591 = vmatprep.subr.mxu0 %v5238_v21 }
 0x14c   : > { %4592 = vmatpush3.msra.mxu0 %v5479_v20  ;;  %v1560_v20 = vld [vmem:[#allocation6] sm:$0xff] }
 0x14d   : > { %4593 = vmatprep.subr.mxu0 %v5238_v21  ;;  %v1772_v21 = vsub.f32 %v5684_v10, %v5691_v15  ;;  %v5708_v28 = vand.u32 4294901760, %v1560_v20 }
 0x14e   : > { %4594 = vmatpush3.msra.mxu0 %v5494_v25  ;;  %v5706_v25 = vsub.f32 %v1561_v12, %v5696_v17 }
 0x14f   : > { %4596 = vmatmul.mubr.f32.vlgmr.msra.gmra.mxu0 %v5608_v53  ;;  %4609 = vmatprep.subr.mxu0 %v5681_v7  ;;  %v1773_v55 = vand.u32 4294901760, %v1772_v21  ;;  %v5718_v59 = vsub.f32 %v1560_v20, %v5708_v28 }
 0x150   : > { %4610 = vmatpush3.msra.mxu0 %v5681_v7  ;;  %v5715_v58 = vand.u32 4294901760, %v5706_v25 }
 0x151   : > { %4611 = vmatprep.subr.mxu0 %v5686_v11  ;;  %4629 = vmatprep.subr.mxu1 %v1773_v55  ;;  %v5725_v62 = vand.u32 4294901760, %v5718_v59 }
 0x152   : > { %4612 = vmatpush3.msra.mxu0 %v5686_v11  ;;  %v1786_v61 = vsub.f32 %v5706_v25, %v5715_v58  ;;  %4630 = vmatpush3.msra.mxu1 %v1773_v55 }
 0x153   : > { %4613 = vmatprep.subr.mxu0 %v5696_v17  ;;  %4631 = vmatprep.subr.mxu1 %v1780_v60  ;;  %v1793_v0 = vsub.f32 %v5718_v59, %v5725_v62 }
 0x154   : > { %4614 = vmatpush3.msra.mxu0 %v5696_v17  ;;  %v1787_v63 = vand.u32 4294901760, %v1786_v61  ;;  %4632 = vmatpush3.msra.mxu1 %v1780_v60  ;;  %v1535_v61 = vshrl.u32 %v1534_v57, 7 }
 0x155   : > { %4615 = vmatprep.subr.mxu0 %v5708_v28  ;;  %v1794_v2 = vand.u32 4294901760, %v1793_v0 }
 0x156   : > { %4616 = vmatpush3.msra.mxu0 %v5708_v28  ;;  %4633 = vmatprep.subr.mxu1 %v1787_v63 }
 0x157   : > { %4649 = vmatprep.subr.mxu0 %v5684_v10  ;;  %4634 = vmatpush3.msra.mxu1 %v1787_v63  ;;  %v1536_v63 = vsub.s32 0, %v1535_v61 }
 0x158   : > { %4635 = vmatprep.subr.mxu1 %v1794_v2 }
 0x159   : > { %4636 = vmatpush3.msra.mxu1 %v1794_v2 }
 0x15a   : > { %4669 = vmatprep.subr.mxu1 %v5681_v7 }
 0x1d7   : > { %v723_v3 = vpop.f32.mrf.mxu1 }
 0x1d9   : > { %v4498_v4 = vpop.f32.mrf.mxu1 }
 0x1df   : > { %v880_v6 = vpop.f32.mrf.mxu1 }
 0x1e0   : > { %v632_v9 = vpop.f32.mrf.mxu0 }
 0x1e1   : > { %v4520_v13 = vpop.f32.mrf.mxu1  ;;  %v724_v43 = vadd.f32 %v723_v3, %v632_v9 }
 0x1e2   : > { %v4487_v14 = vpop.f32.mrf.mxu0 }
 0x1e8   : > { %v803_v19 = vpop.f32.mrf.mxu0 }
 0x1e9   : > { %v1038_v24 = vpop.f32.mrf.mxu1  ;;  %v804_v44 = vadd.f32 %v803_v19, %v724_v43 }
 0x1ea   : > { %v4509_v27 = vpop.f32.mrf.mxu0 }
 0x1eb   : > { %v4542_v33 = vpop.f32.mrf.mxu1  ;;  %v881_v46 = vadd.f32 %v880_v6, %v804_v44 }
 0x1f2   : > { %v963_v34 = vpop.f32.mrf.mxu0 }
 0x1f3   : > { %v1212_v36 = vpop.f32.mrf.mxu1  ;;  %v964_v49 = vadd.f32 %v963_v34, %v881_v46 }
 0x1f4   : > { %v4531_v37 = vpop.f32.mrf.mxu0 }
 0x1f5   : > { %v4564_v38 = vpop.f32.mrf.mxu1  ;;  %v1039_v54 = vadd.f32 %v1038_v24, %v964_v49 }
 0x1f7   : > { %v1042_v26 = vmul.f32 0.00390625, %v1039_v54 }
 0x1f9   : > { %v1532_v20 = vmul.f32 %v1042_v26, %v1042_v26  ;;  %v1537_v0 = vrot.slane %v1042_v26, %v1536_v63 }
 0x1fb   : > { %v1538_v3 = vsub.f32 %v5519_v29, %v1537_v0  ;;  %v1539_v4 = vsub.f32 %v5521_v30, %v1537_v0  ;;  %v1540_v6 = vsub.f32 %v5523_v31, %v1537_v0  ;;  %v1541_v9 = vsub.f32 %v5525_v32, %v1537_v0 }
 0x1fc   : > { %v1121_v39 = vpop.f32.mrf.mxu0  ;;  %v1542_v14 = vsub.f32 %v5531_v35, %v1537_v0  ;;  %v1543_v19 = vsub.f32 %v5546_v45, %v1537_v0  ;;  %v1544_v24 = vsub.f32 %v5559_v56, %v1537_v0  ;;  %v1545_v27 = vsub.f32 %v5567_v1, %v1537_v0 }
 0x1fd   : > { %v1369_v40 = vpop.f32.mrf.mxu1  ;;  %v1213_v50 = vadd.f32 %v1212_v36, %v1121_v39 }
 0x1fe   : > { %v4553_v41 = vpop.f32.mrf.mxu0 }
 0x1ff   : > { %v4586_v42 = vpop.f32.mrf.mxu1 }
 0x206   : > { %v1292_v47 = vpop.f32.mrf.mxu0 }
 0x207   : > { %v1527_v48 = vpop.f32.mrf.mxu1  ;;  %v1293_v53 = vadd.f32 %v1292_v47, %v1213_v50 }
 0x208   : > { %v4575_v51 = vpop.f32.mrf.mxu0 }
 0x209   : > { %v4608_v52 = vpop.f32.mrf.mxu1  ;;  %v1370_v18 = vadd.f32 %v1369_v40, %v1293_v53 }
 0x20f   : > { %v1452_v23 = vpop.f32.mrf.mxu0 }
 0x210   : > { %v1453_v5 = vadd.f32 %v1452_v23, %v1370_v18 }
 0x211   : > { %v4597_v8 = vpop.f32.mrf.mxu0 }
 0x212   : > { %v1528_v12 = vadd.f32 %v1527_v48, %v1453_v5 }
 0x214   : > { %v1531_v21 = vmul.f32 0.00390625, %v1528_v12 }
 0x216   : > { %v1533_v55 = vsub.f32 %v1531_v21, %v1532_v20 }
 0x218   : > { %v1546_v60 = vadd.f32 1e-05, %v1533_v55 }
 0x21a   : > { %5053 = vrsqrt.f32 %v1546_v60 }
 0x227   : > { %v5054_v2 = vpop.eup %5053 }
 0x228   : > { %v1551_v13 = vrot.slane %v5054_v2, %v1536_v63 }
 0x22a   : > { %v1552_v33 = vmul.f32 %v1551_v13, %v1538_v3  ;;  %v1553_v34 = vmul.f32 %v1551_v13, %v1539_v4  ;;  %v1554_v36 = vmul.f32 %v1551_v13, %v1540_v6  ;;  %v1555_v37 = vmul.f32 %v1551_v13, %v1541_v9 }
 0x22b   : > { %v1556_v29 = vmul.f32 %v1551_v13, %v1542_v14  ;;  %v1557_v38 = vmul.f32 %v1551_v13, %v1543_v19  ;;  %v1558_v30 = vmul.f32 %v1551_v13, %v1544_v24  ;;  %v1559_v39 = vmul.f32 %v1551_v13, %v1545_v27  ;;  %v2392_v27 = vld [vmem:[#allocation7 + $0x18] sm:$0xff] }
 0x22c   : > { %v1572_v31 = vsel %vm499_vm1, %v1552_v33, 0  ;;  %v1575_v32 = vsel %vm499_vm1, %v1553_v34, 0  ;;  %v1578_v35 = vsel %vm499_vm1, %v1554_v36, 0  ;;  %v1581_v45 = vsel %vm499_vm1, %v1555_v37, 0  ;;  %v2391_v37 = vld [vmem:[#allocation7 + $0x10] sm:$0xff] }
 0x22d   : > { %v5743_v40 = vand.u32 4294901760, %v1572_v31  ;;  %v5745_v56 = vand.u32 4294901760, %v1575_v32  ;;  %v5747_v1 = vand.u32 4294901760, %v1578_v35  ;;  %v5749_v41 = vand.u32 4294901760, %v1581_v45 }
 0x22e   : > { %v1584_v42 = vsel %vm499_vm1, %v1556_v29, 0  ;;  %v1587_v43 = vsel %vm499_vm1, %v1557_v38, 0  ;;  %v1590_v44 = vsel %vm499_vm1, %v1558_v30, 0  ;;  %v1593_v46 = vsel %vm499_vm1, %v1559_v39, 0  ;;  %v2390_v30 = vld [vmem:[#allocation7 + $0x8] sm:$0xff] }
 0x22f   : > { %4637 = vmatprep.mubr.f32.mxu1 %v5743_v40  ;;  %v5756_v47 = vand.u32 4294901760, %v1584_v42  ;;  %v5759_v48 = vsub.f32 %v1572_v31, %v5743_v40  ;;  %v5762_v49 = vsub.f32 %v1575_v32, %v5745_v56  ;;  %v5764_v50 = vand.u32 4294901760, %v1587_v43  ;;  %v2389_v31 = vld [vmem:[#allocation7] sm:$0xff] }
 0x230   : > { %4638 = vmatmul.mubr.f32.vlgmr.msra.gmra.mxu1 %v5745_v56  ;;  %v5768_v51 = vsub.f32 %v1578_v35, %v5747_v1  ;;  %v5770_v52 = vand.u32 4294901760, %v1590_v44  ;;  %v5773_v53 = vsub.f32 %v1581_v45, %v5749_v41  ;;  %v5793_v8 = vand.u32 4294901760, %v1593_v46 }
 0x231   : > { %4640 = vmatprep.mubr.f32.mxu1 %v5747_v1  ;;  %v5777_v54 = vand.u32 4294901760, %v5759_v48  ;;  %v5780_v18 = vand.u32 4294901760, %v5762_v49  ;;  %4670 = vmatpush3.msra.mxu1 %v5681_v7  ;;  %v5784_v23 = vsub.f32 %v1584_v42, %v5756_v47  ;;  %v5796_v12 = vsub.f32 %v1587_v43, %v5764_v50 }
 0x232   : > { %v5787_v26 = vand.u32 4294901760, %v5768_v51  ;;  %4671 = vmatprep.subr.mxu1 %v5686_v11  ;;  %v5791_v5 = vand.u32 4294901760, %v5773_v53  ;;  %v5807_v57 = vsub.f32 %v1590_v44, %v5770_v52  ;;  %v5826_v3 = vsub.f32 %v1593_v46, %v5793_v8 }
 0x233   : > { %v1667_v20 = vsub.f32 %v5759_v48, %v5777_v54  ;;  %v1677_v21 = vsub.f32 %v5762_v49, %v5780_v18  ;;  %4672 = vmatpush3.msra.mxu1 %v5686_v11  ;;  %v5804_v55 = vand.u32 4294901760, %v5784_v23  ;;  %v5823_v2 = vand.u32 4294901760, %v5796_v12 }
 0x234   : > { %4641 = vmatmul.mubr.f32.gmra.mxu1 %v5749_v41  ;;  %v1687_v60 = vsub.f32 %v5768_v51, %v5787_v26  ;;  %4673 = vmatprep.subr.mxu1 %v5696_v17  ;;  %v1697_v0 = vsub.f32 %v5773_v53, %v5791_v5  ;;  %v5835_v9 = vand.u32 4294901760, %v5807_v57  ;;  %v5848_v19 = vand.u32 4294901760, %v5826_v3 }
 0x235   : > { %4643 = vmatprep.mubr.f32.mxu1 %v5756_v47  ;;  %v5814_v61 = vand.u32 4294901760, %v1667_v20  ;;  %v5816_v63 = vand.u32 4294901760, %v1677_v21  ;;  %4674 = vmatpush3.msra.mxu1 %v5696_v17  ;;  %v1707_v6 = vsub.f32 %v5784_v23, %v5804_v55  ;;  %v1717_v14 = vsub.f32 %v5796_v12, %v5823_v2  ;;  %v3197_v20 = vld [vmem:[#allocation9 + $0x18] sm:$0xff] }
 0x236   : > { %4675 = vmatprep.subr.mxu1 %v5708_v28  ;;  %v5829_v4 = vand.u32 4294901760, %v1687_v60  ;;  %v5843_v13 = vand.u32 4294901760, %v1697_v0  ;;  %v5865_v34 = vand.u32 4294901760, %v2392_v27  ;;  %v5898_v39 = vand.u32 4294901760, %v2390_v30  ;;  %v3196_v60 = vld [vmem:[#allocation9 + $0x10] sm:$0xff] }
 0x237   : > { %4617 = vmatprep.mubr.f32.mxu0 %v5814_v61  ;;  %4676 = vmatpush3.msra.mxu1 %v5708_v28  ;;  %v5851_v24 = vand.u32 4294901760, %v1707_v6  ;;  %v5861_v33 = vand.u32 4294901760, %v1717_v14  ;;  %v5911_v35 = vand.u32 4294901760, %v2389_v31  ;;  %v5995_v21 = vand.u32 4294901760, %v3197_v20  ;;  %v3195_v14 = vld [vmem:[#allocation9 + $0x8] sm:$0xff] }
 0x238   : > { %4618 = vmatmul.mubr.f32.vlgmr.msra.gmra.mxu0 %v5816_v63  ;;  %4644 = vmatmul.mubr.f32.gmra.mxu1 %v5764_v50  ;;  %v5879_v38 = vsub.f32 %v2392_v27, %v5865_v34  ;;  %v6008_v6 = vand.u32 4294901760, %v3196_v60 }
 0x239   : > { %4650 = vmatpush3.msra.mxu0 %v5684_v10  ;;  %4620 = vmatprep.mubr.f32.mxu0 %v5829_v4  ;;  %v1727_v10 = vsub.f32 %v5807_v57, %v5835_v9  ;;  %v6006_v0 = vsub.f32 %v3197_v20, %v5995_v21 }
 0x23a   : > { %4646 = vmatprep.mubr.f32.mxu1 %v5770_v52  ;;  %4651 = vmatprep.subr.mxu0 %v5694_v16  ;;  %v6022_v27 = vsub.f32 %v3196_v60, %v6008_v6 }
 0x23b   : > { %4652 = vmatpush3.msra.mxu0 %v5694_v16  ;;  %4709 = vmatprep.subr.mxu1 %v5681_v7  ;;  %v1737_v16 = vsub.f32 %v5826_v3, %v5848_v19  ;;  %v5868_v36 = vand.u32 4294901760, %v1727_v10  ;;  %v6019_v10 = vand.u32 4294901760, %v6006_v0 }
 0x23c   : > { %4621 = vmatmul.mubr.f32.gmra.mxu0 %v5843_v13  ;;  %4647 = vmatmul.mubr.f32.gmra.mxu1 %v5793_v8 }
 0x23d   : > { %4623 = vmatprep.mubr.f32.mxu0 %v5851_v24  ;;  %4677 = vmatprep.mubr.f32.mxu1 %v5777_v54  ;;  %v5875_v29 = vand.u32 4294901760, %v1737_v16  ;;  %v6024_v16 = vand.u32 4294901760, %v3195_v14 }
 0x23e   : > { %4653 = vmatprep.subr.mxu0 %v5706_v25 }
 0x23f   : > { %4654 = vmatpush3.msra.mxu0 %v5706_v25  ;;  %v5881_v25 = vand.u32 4294901760, %v2391_v37 }
 0x240   : > { %4624 = vmatmul.mubr.f32.gmra.mxu0 %v5861_v33  ;;  %4678 = vmatmul.mubr.f32.vlgmr.msra.gmra.mxu1 %v5780_v18 }
 0x241   : > { %4626 = vmatprep.mubr.f32.mxu0 %v5868_v36  ;;  %4680 = vmatprep.mubr.f32.mxu1 %v5787_v26 }
 0x242   : > { %4655 = vmatprep.subr.mxu0 %v5718_v59  ;;  %4710 = vmatpush3.msra.mxu1 %v5681_v7  ;;  %v5892_v7 = vand.u32 4294901760, %v5879_v38 }
 0x243   : > { %4656 = vmatpush3.msra.mxu0 %v5718_v59  ;;  %4711 = vmatprep.subr.mxu1 %v5686_v11  ;;  %v5895_v59 = vsub.f32 %v2391_v37, %v5881_v25  ;;  %v3382_v37 = vsub.f32 %v6006_v0, %v6019_v10 }
 0x244   : > { %4627 = vmatmul.mubr.f32.gmra.mxu0 %v5875_v29  ;;  %4681 = vmatmul.mubr.f32.gmra.mxu1 %v5791_v5 }
 0x245   : > { %4657 = vmatprep.mubr.f32.mxu0 %v5759_v48  ;;  %4683 = vmatprep.mubr.f32.mxu1 %v5804_v55  ;;  %v5909_v32 = vand.u32 4294901760, %v5895_v59 }
 0x246   : > { %4689 = vmatprep.subr.mxu0 %v5691_v15  ;;  %4712 = vmatpush3.msra.mxu1 %v5686_v11  ;;  %v2577_v11 = vsub.f32 %v5879_v38, %v5892_v7 }
 0x247   : > { %4713 = vmatprep.subr.mxu1 %v5696_v17 }
 0x248   : > { %4658 = vmatmul.mubr.f32.vlgmr.msra.gmra.mxu0 %v5762_v49  ;;  %4684 = vmatmul.mubr.f32.gmra.mxu1 %v5823_v2  ;;  %v2578_v45 = vand.u32 4294901760, %v2577_v11 }
 0x249   : > { %4690 = vmatpush3.msra.mxu0 %v5691_v15  ;;  %4660 = vmatprep.mubr.f32.mxu0 %v5768_v51  ;;  %v5916_v15 = vsub.f32 %v2390_v30, %v5898_v39 }
 0x24a   : > { %4686 = vmatprep.mubr.f32.mxu1 %v5835_v9  ;;  %4691 = vmatprep.subr.mxu0 %v5703_v22 }
 0x24b   : > { %4692 = vmatpush3.msra.mxu0 %v5703_v22  ;;  %4714 = vmatpush3.msra.mxu1 %v5696_v17  ;;  %v2584_v22 = vsub.f32 %v5895_v59, %v5909_v32  ;;  %v5927_v17 = vsub.f32 %v2389_v31, %v5911_v35  ;;  %v5932_v42 = vand.u32 4294901760, %v5916_v15 }
 0x24c   : > { %4661 = vmatmul.mubr.f32.gmra.mxu0 %v5773_v53  ;;  %4687 = vmatmul.mubr.f32.gmra.mxu1 %v5848_v19 }
 0x24d   : > { %4663 = vmatprep.mubr.f32.mxu0 %v5784_v23  ;;  %4717 = vmatprep.mubr.f32.mxu1 %v5743_v40  ;;  %v2585_v43 = vand.u32 4294901760, %v2584_v22  ;;  %v5940_v44 = vand.u32 4294901760, %v5927_v17 }
 0x24e   : > { %4715 = vmatprep.subr.mxu1 %v5708_v28  ;;  %4693 = vmatprep.subr.mxu0 %v5715_v58 }
 0x24f   : > { %4716 = vmatpush3.msra.mxu1 %v5708_v28  ;;  %4694 = vmatpush3.msra.mxu0 %v5715_v58  ;;  %v2591_v28 = vsub.f32 %v5916_v15, %v5932_v42  ;;  %v2598_v58 = vsub.f32 %v5927_v17, %v5940_v44 }
 0x250   : > { %4664 = vmatmul.mubr.f32.gmra.mxu0 %v5796_v12  ;;  %4718 = vmatmul.mubr.f32.vlgmr.msra.gmra.mxu1 %v5745_v56 }
 0x251   : > { %4666 = vmatprep.mubr.f32.mxu0 %v5807_v57  ;;  %4720 = vmatprep.mubr.f32.mxu1 %v5747_v1  ;;  %v2599_v46 = vand.u32 4294901760, %v2598_v58 }
 0x252   : > { %4695 = vmatprep.subr.mxu0 %v5725_v62  ;;  %4749 = vmatprep.subr.mxu1 %v2578_v45 }
 0x253   : > { %4696 = vmatpush3.msra.mxu0 %v5725_v62  ;;  %4750 = vmatpush3.msra.mxu1 %v2578_v45  ;;  %v2592_v62 = vand.u32 4294901760, %v2591_v28 }
 0x254   : > { %4667 = vmatmul.mubr.f32.gmra.mxu0 %v5826_v3  ;;  %4721 = vmatmul.mubr.f32.gmra.mxu1 %v5749_v41 }
 0x255   : > { %4697 = vmatprep.mubr.f32.mxu0 %v5743_v40  ;;  %4723 = vmatprep.mubr.f32.mxu1 %v5756_v47 }
 0x256   : > { %4729 = vmatprep.subr.mxu0 %v5865_v34  ;;  %4751 = vmatprep.subr.mxu1 %v2585_v43 }
 0x257   : > { %4752 = vmatpush3.msra.mxu1 %v2585_v43 }
 0x258   : > { %4698 = vmatmul.mubr.f32.vlgmr.msra.gmra.mxu0 %v5745_v56  ;;  %4724 = vmatmul.mubr.f32.gmra.mxu1 %v5764_v50 }
 0x259   : > { %4730 = vmatpush3.msra.mxu0 %v5865_v34  ;;  %4700 = vmatprep.mubr.f32.mxu0 %v5747_v1 }
 0x25a   : > { %4726 = vmatprep.mubr.f32.mxu1 %v5770_v52  ;;  %4731 = vmatprep.subr.mxu0 %v5881_v25 }
 0x25b   : > { %4732 = vmatpush3.msra.mxu0 %v5881_v25  ;;  %4753 = vmatprep.subr.mxu1 %v2592_v62 }
 0x25c   : > { %4701 = vmatmul.mubr.f32.gmra.mxu0 %v5749_v41  ;;  %4727 = vmatmul.mubr.f32.gmra.mxu1 %v5793_v8 }
 0x25d   : > { %4703 = vmatprep.mubr.f32.mxu0 %v5756_v47  ;;  %4754 = vmatpush3.msra.mxu1 %v2592_v62 }
 0x25e   : > { %4757 = vmatprep.mubr.f32.mxu1 %v5743_v40  ;;  %4755 = vmatprep.subr.mxu1 %v2599_v46 }
 0x25f   : > { %4733 = vmatprep.subr.mxu0 %v5898_v39  ;;  %4756 = vmatpush3.msra.mxu1 %v2599_v46 }
 0x260   : > { %4704 = vmatmul.mubr.f32.gmra.mxu0 %v5764_v50  ;;  %4758 = vmatmul.mubr.f32.vlgmr.msra.gmra.mxu1 %v5745_v56 }
 0x261   : > { %4734 = vmatpush3.msra.mxu0 %v5898_v39  ;;  %4706 = vmatprep.mubr.f32.mxu0 %v5770_v52 }
 0x262   : > { %4760 = vmatprep.mubr.f32.mxu1 %v5747_v1  ;;  %4735 = vmatprep.subr.mxu0 %v5911_v35 }
 0x263   : > { %4736 = vmatpush3.msra.mxu0 %v5911_v35  ;;  %4789 = vmatprep.subr.mxu1 %v5865_v34 }
 0x264   : > { %4707 = vmatmul.mubr.f32.gmra.mxu0 %v5793_v8  ;;  %4761 = vmatmul.mubr.f32.gmra.mxu1 %v5749_v41 }
 0x265   : > { %4737 = vmatprep.mubr.f32.mxu0 %v5814_v61  ;;  %4763 = vmatprep.mubr.f32.mxu1 %v5756_v47 }
 0x266   : > { %4769 = vmatprep.subr.mxu0 %v5879_v38  ;;  %4790 = vmatpush3.msra.mxu1 %v5865_v34 }
 0x267   : > { %4791 = vmatprep.subr.mxu1 %v5881_v25 }
 0x268   : > { %4738 = vmatmul.mubr.f32.vlgmr.msra.gmra.mxu0 %v5816_v63  ;;  %4764 = vmatmul.mubr.f32.gmra.mxu1 %v5764_v50 }
 0x269   : > { %4770 = vmatpush3.msra.mxu0 %v5879_v38  ;;  %4740 = vmatprep.mubr.f32.mxu0 %v5829_v4  ;;  %v6037_v38 = vand.u32 4294901760, %v6022_v27 }
 0x26a   : > { %4766 = vmatprep.mubr.f32.mxu1 %v5770_v52  ;;  %4771 = vmatprep.subr.mxu0 %v5895_v59 }
 0x26b   : > { %4792 = vmatpush3.msra.mxu1 %v5881_v25  ;;  %4772 = vmatpush3.msra.mxu0 %v5895_v59  ;;  %v3389_v59 = vsub.f32 %v6022_v27, %v6037_v38 }
 0x26c   : > { %4741 = vmatmul.mubr.f32.gmra.mxu0 %v5843_v13  ;;  %4767 = vmatmul.mubr.f32.gmra.mxu1 %v5793_v8 }
 0x26d   : > { %4793 = vmatprep.subr.mxu1 %v5898_v39  ;;  %4743 = vmatprep.mubr.f32.mxu0 %v5851_v24  ;;  %v3390_v11 = vand.u32 4294901760, %v3389_v59 }
 0x26e   : > { %4794 = vmatpush3.msra.mxu1 %v5898_v39  ;;  %4797 = vmatprep.mubr.f32.mxu1 %v5777_v54 }
 0x26f   : > { %4795 = vmatprep.subr.mxu1 %v5911_v35  ;;  %4773 = vmatprep.subr.mxu0 %v5916_v15 }
 0x270   : > { %4796 = vmatpush3.msra.mxu1 %v5911_v35  ;;  %4744 = vmatmul.mubr.f32.gmra.mxu0 %v5861_v33 }
 0x271   : > { %4774 = vmatpush3.msra.mxu0 %v5916_v15  ;;  %4798 = vmatmul.mubr.f32.vlgmr.msra.gmra.mxu1 %v5780_v18 }
 0x272   : > { %4746 = vmatprep.mubr.f32.mxu0 %v5868_v36  ;;  %4800 = vmatprep.mubr.f32.mxu1 %v5787_v26 }
 0x273   : > { %4775 = vmatprep.subr.mxu0 %v5927_v17  ;;  %4829 = vmatprep.subr.mxu1 %v5865_v34 }
 0x274   : > { %4747 = vmatmul.mubr.f32.gmra.mxu0 %v5875_v29  ;;  %4830 = vmatpush3.msra.mxu1 %v5865_v34  ;;  %v3194_v34 = vld [vmem:[#allocation9] sm:$0xff] }
 0x275   : > { %4776 = vmatpush3.msra.mxu0 %v5927_v17  ;;  %4801 = vmatmul.mubr.f32.gmra.mxu1 %v5791_v5  ;;  %v6042_v30 = vand.u32 4294901760, %v3194_v34 }
 0x276   : > { %4777 = vmatprep.mubr.f32.mxu0 %v5759_v48  ;;  %4803 = vmatprep.mubr.f32.mxu1 %v5804_v55 }
 0x277   : > { %4809 = vmatprep.subr.mxu0 %v5892_v7  ;;  %4831 = vmatprep.subr.mxu1 %v5881_v25 }
 0x278   : > { %4778 = vmatmul.mubr.f32.vlgmr.msra.gmra.mxu0 %v5762_v49  ;;  %4832 = vmatpush3.msra.mxu1 %v5881_v25  ;;  %v6040_v25 = vsub.f32 %v3195_v14, %v6024_v16 }
 0x279   : > { %4804 = vmatmul.mubr.f32.gmra.mxu1 %v5823_v2  ;;  %4810 = vmatpush3.msra.mxu0 %v5892_v7  ;;  %v3383_v7 = vand.u32 4294901760, %v3382_v37 }
 0x27a   : > { %4780 = vmatprep.mubr.f32.mxu0 %v5768_v51  ;;  %4806 = vmatprep.mubr.f32.mxu1 %v5835_v9  ;;  %v6055_v31 = vand.u32 4294901760, %v6040_v25 }
 0x27b   : > { %4811 = vmatprep.subr.mxu0 %v5909_v32  ;;  %4833 = vmatprep.subr.mxu1 %v5898_v39 }
 0x27c   : > { %4781 = vmatmul.mubr.f32.gmra.mxu0 %v5773_v53  ;;  %4834 = vmatpush3.msra.mxu1 %v5898_v39  ;;  %v6058_v39 = vsub.f32 %v3194_v34, %v6042_v30 }
 0x27d   : > { %4807 = vmatmul.mubr.f32.gmra.mxu1 %v5848_v19  ;;  %4812 = vmatpush3.msra.mxu0 %v5909_v32  ;;  %v3396_v32 = vsub.f32 %v6040_v25, %v6055_v31 }
 0x27e   : > { %4783 = vmatprep.mubr.f32.mxu0 %v5784_v23  ;;  %4837 = vmatprep.mubr.f32.mxu1 %v5743_v40  ;;  %v6070_v15 = vand.u32 4294901760, %v6058_v39 }
 0x27f   : > { %4835 = vmatprep.subr.mxu1 %v5911_v35  ;;  %4813 = vmatprep.subr.mxu0 %v5932_v42 }
 0x280   : > { %4836 = vmatpush3.msra.mxu1 %v5911_v35  ;;  %4784 = vmatmul.mubr.f32.gmra.mxu0 %v5796_v12  ;;  %v3397_v35 = vand.u32 4294901760, %v3396_v32  ;;  %v3403_v45 = vsub.f32 %v6058_v39, %v6070_v15 }
 0x281   : > { %4814 = vmatpush3.msra.mxu0 %v5932_v42  ;;  %4838 = vmatmul.mubr.f32.vlgmr.msra.gmra.mxu1 %v5745_v56 }
 0x282   : > { %4786 = vmatprep.mubr.f32.mxu0 %v5807_v57  ;;  %4840 = vmatprep.mubr.f32.mxu1 %v5747_v1  ;;  %v3404_v22 = vand.u32 4294901760, %v3403_v45 }
 0x283   : > { %4815 = vmatprep.subr.mxu0 %v5940_v44  ;;  %4869 = vmatprep.subr.mxu1 %v3383_v7 }
 0x284   : > { %4787 = vmatmul.mubr.f32.gmra.mxu0 %v5826_v3  ;;  %4870 = vmatpush3.msra.mxu1 %v3383_v7 }
 0x285   : > { %4816 = vmatpush3.msra.mxu0 %v5940_v44  ;;  %4841 = vmatmul.mubr.f32.gmra.mxu1 %v5749_v41 }
 0x286   : > { %4817 = vmatprep.mubr.f32.mxu0 %v5743_v40  ;;  %4843 = vmatprep.mubr.f32.mxu1 %v5756_v47 }
 0x287   : > { %4849 = vmatprep.subr.mxu0 %v5995_v21  ;;  %4871 = vmatprep.subr.mxu1 %v3390_v11 }
 0x288   : > { %4818 = vmatmul.mubr.f32.vlgmr.msra.gmra.mxu0 %v5745_v56  ;;  %4872 = vmatpush3.msra.mxu1 %v3390_v11 }
 0x289   : > { %4844 = vmatmul.mubr.f32.gmra.mxu1 %v5764_v50  ;;  %4850 = vmatpush3.msra.mxu0 %v5995_v21 }
 0x28a   : > { %4820 = vmatprep.mubr.f32.mxu0 %v5747_v1  ;;  %4846 = vmatprep.mubr.f32.mxu1 %v5770_v52 }
 0x28b   : > { %4851 = vmatprep.subr.mxu0 %v6008_v6  ;;  %4873 = vmatprep.subr.mxu1 %v3397_v35 }
 0x28c   : > { %4821 = vmatmul.mubr.f32.gmra.mxu0 %v5749_v41  ;;  %4874 = vmatpush3.msra.mxu1 %v3397_v35 }
 0x28d   : > { %4847 = vmatmul.mubr.f32.gmra.mxu1 %v5793_v8  ;;  %4852 = vmatpush3.msra.mxu0 %v6008_v6 }
 0x28e   : > { %4823 = vmatprep.mubr.f32.mxu0 %v5756_v47  ;;  %4877 = vmatprep.mubr.f32.mxu1 %v5743_v40 }
 0x28f   : > { %4875 = vmatprep.subr.mxu1 %v3404_v22  ;;  %4853 = vmatprep.subr.mxu0 %v6024_v16 }
 0x290   : > { %4876 = vmatpush3.msra.mxu1 %v3404_v22  ;;  %4824 = vmatmul.mubr.f32.gmra.mxu0 %v5764_v50 }
 0x291   : > { %4854 = vmatpush3.msra.mxu0 %v6024_v16  ;;  %4878 = vmatmul.mubr.f32.vlgmr.msra.gmra.mxu1 %v5745_v56 }
 0x292   : > { %4826 = vmatprep.mubr.f32.mxu0 %v5770_v52  ;;  %4880 = vmatprep.mubr.f32.mxu1 %v5747_v1 }
 0x293   : > { %4855 = vmatprep.subr.mxu0 %v6042_v30  ;;  %4909 = vmatprep.subr.mxu1 %v5995_v21 }
 0x294   : > { %4827 = vmatmul.mubr.f32.gmra.mxu0 %v5793_v8  ;;  %4910 = vmatpush3.msra.mxu1 %v5995_v21 }
 0x295   : > { %4856 = vmatpush3.msra.mxu0 %v6042_v30  ;;  %4881 = vmatmul.mubr.f32.gmra.mxu1 %v5749_v41 }
 0x296   : > { %4857 = vmatprep.mubr.f32.mxu0 %v5814_v61  ;;  %4883 = vmatprep.mubr.f32.mxu1 %v5756_v47 }
 0x297   : > { %4889 = vmatprep.subr.mxu0 %v6006_v0  ;;  %4911 = vmatprep.subr.mxu1 %v6008_v6 }
 0x298   : > { %4858 = vmatmul.mubr.f32.vlgmr.msra.gmra.mxu0 %v5816_v63  ;;  %4912 = vmatpush3.msra.mxu1 %v6008_v6 }
 0x299   : > { %4884 = vmatmul.mubr.f32.gmra.mxu1 %v5764_v50  ;;  %4890 = vmatpush3.msra.mxu0 %v6006_v0 }
 0x29a   : > { %4860 = vmatprep.mubr.f32.mxu0 %v5829_v4  ;;  %4886 = vmatprep.mubr.f32.mxu1 %v5770_v52 }
 0x29b   : > { %4891 = vmatprep.subr.mxu0 %v6022_v27  ;;  %4913 = vmatprep.subr.mxu1 %v6024_v16 }
 0x29c   : > { %4861 = vmatmul.mubr.f32.gmra.mxu0 %v5843_v13  ;;  %4914 = vmatpush3.msra.mxu1 %v6024_v16 }
 0x29d   : > { %4887 = vmatmul.mubr.f32.gmra.mxu1 %v5793_v8  ;;  %4892 = vmatpush3.msra.mxu0 %v6022_v27 }
 0x29e   : > { %4863 = vmatprep.mubr.f32.mxu0 %v5851_v24  ;;  %4917 = vmatprep.mubr.f32.mxu1 %v5777_v54 }
 0x29f   : > { %4915 = vmatprep.subr.mxu1 %v6042_v30  ;;  %4893 = vmatprep.subr.mxu0 %v6040_v25 }
 0x2a0   : > { %4916 = vmatpush3.msra.mxu1 %v6042_v30  ;;  %4864 = vmatmul.mubr.f32.gmra.mxu0 %v5861_v33 }
 0x2a1   : > { %4894 = vmatpush3.msra.mxu0 %v6040_v25  ;;  %4918 = vmatmul.mubr.f32.vlgmr.msra.gmra.mxu1 %v5780_v18 }
 0x2a2   : > { %4866 = vmatprep.mubr.f32.mxu0 %v5868_v36  ;;  %4920 = vmatprep.mubr.f32.mxu1 %v5787_v26 }
 0x2a3   : > { %4895 = vmatprep.subr.mxu0 %v6058_v39  ;;  %4949 = vmatprep.subr.mxu1 %v5995_v21 }
 0x2a4   : > { %4867 = vmatmul.mubr.f32.gmra.mxu0 %v5875_v29  ;;  %4950 = vmatpush3.msra.mxu1 %v5995_v21 }
 0x2a5   : > { %4896 = vmatpush3.msra.mxu0 %v6058_v39  ;;  %4921 = vmatmul.mubr.f32.gmra.mxu1 %v5791_v5 }
 0x2a6   : > { %4897 = vmatprep.mubr.f32.mxu0 %v5759_v48  ;;  %4923 = vmatprep.mubr.f32.mxu1 %v5804_v55 }
 0x2a7   : > { %4929 = vmatprep.subr.mxu0 %v6019_v10  ;;  %4951 = vmatprep.subr.mxu1 %v6008_v6 }
 0x2a8   : > { %4898 = vmatmul.mubr.f32.vlgmr.msra.gmra.mxu0 %v5762_v49  ;;  %4952 = vmatpush3.msra.mxu1 %v6008_v6 }
 0x2a9   : > { %4924 = vmatmul.mubr.f32.gmra.mxu1 %v5823_v2  ;;  %4930 = vmatpush3.msra.mxu0 %v6019_v10  ;;  %v4192_v2 = vld [vmem:[%s6307_s5] ss:$0 sm:$0xff] }
 0x2aa   : > { %4900 = vmatprep.mubr.f32.mxu0 %v5768_v51  ;;  %4926 = vmatprep.mubr.f32.mxu1 %v5835_v9 }
 0x2ab   : > { %4931 = vmatprep.subr.mxu0 %v6037_v38  ;;  %4953 = vmatprep.subr.mxu1 %v6024_v16 }
 0x2ac   : > { %4901 = vmatmul.mubr.f32.gmra.mxu0 %v5773_v53  ;;  %4954 = vmatpush3.msra.mxu1 %v6024_v16 }
 0x2ad   : > { %4927 = vmatmul.mubr.f32.gmra.mxu1 %v5848_v19  ;;  %4932 = vmatpush3.msra.mxu0 %v6037_v38 }
 0x2ae   : > { %4903 = vmatprep.mubr.f32.mxu0 %v5784_v23  ;;  %4957 = vmatprep.mubr.f32.mxu1 %v5743_v40 }
 0x2af   : > { %4955 = vmatprep.subr.mxu1 %v6042_v30  ;;  %4933 = vmatprep.subr.mxu0 %v6055_v31 }
 0x2b0   : > { %4956 = vmatpush3.msra.mxu1 %v6042_v30  ;;  %4904 = vmatmul.mubr.f32.gmra.mxu0 %v5796_v12 }
 0x2b1   : > { %4934 = vmatpush3.msra.mxu0 %v6055_v31  ;;  %4958 = vmatmul.mubr.f32.vlgmr.msra.gmra.mxu1 %v5745_v56 }
 0x2b2   : > { %4906 = vmatprep.mubr.f32.mxu0 %v5807_v57  ;;  %4960 = vmatprep.mubr.f32.mxu1 %v5747_v1 }
 0x2b3   : > { %4935 = vmatprep.subr.mxu0 %v6070_v15 }
 0x2b4   : > { %4907 = vmatmul.mubr.f32.gmra.mxu0 %v5826_v3 }
 0x2b5   : > { %4936 = vmatpush3.msra.mxu0 %v6070_v15  ;;  %4961 = vmatmul.mubr.f32.gmra.mxu1 %v5749_v41 }
 0x2b6   : > { %4937 = vmatprep.mubr.f32.mxu0 %v5743_v40  ;;  %4963 = vmatprep.mubr.f32.mxu1 %v5756_v47 }
 0x2b8   : > { %4938 = vmatmul.mubr.f32.vlgmr.msra.gmra.mxu0 %v5745_v56 }
 0x2b9   : > { %4964 = vmatmul.mubr.f32.gmra.mxu1 %v5764_v50  ;;  %4940 = vmatprep.mubr.f32.mxu0 %v5747_v1 }
 0x2ba   : > { %4966 = vmatprep.mubr.f32.mxu1 %v5770_v52 }
 0x2bc   : > { %4941 = vmatmul.mubr.f32.gmra.mxu0 %v5749_v41 }
 0x2bd   : > { %4967 = vmatmul.mubr.f32.gmra.mxu1 %v5793_v8  ;;  %4943 = vmatprep.mubr.f32.mxu0 %v5756_v47 }
 0x2c0   : > { %4944 = vmatmul.mubr.f32.gmra.mxu0 %v5764_v50 }
 0x2c1   : > { %4946 = vmatprep.mubr.f32.mxu0 %v5770_v52 }
 0x2c4   : > { %4947 = vmatmul.mubr.f32.gmra.mxu0 %v5793_v8 }
 0x2f0   : > { %v4639_v40 = vpop.f32.mrf.mxu1 }
 0x2f2   : > { %v1831_v56 = vpop.f32.mrf.mxu1 }
 0x2f4   : > { %v4642_v48 = vpop.f32.mrf.mxu1 }
 0x2f6   : > { %v1843_v49 = vpop.f32.mrf.mxu1 }
 0x2f8   : > { %v4619_v51 = vpop.f32.mrf.mxu0  ;;  %v4645_v1 = vpop.f32.mrf.mxu1 }
 0x2f9   : > { %v1681_v19 = vadd.f32 %v4619_v51, %v4192_v2 }
 0x2fa   : > { %v1670_v53 = vpop.f32.mrf.mxu0  ;;  %v1855_v54 = vpop.f32.mrf.mxu1 }
 0x2fb   : > { %v1671_v36 = vadd.f32 %v4192_v2, %v1670_v53  ;;  %v1838_v43 = vadd.f32 %v4639_v40, %v1681_v19 }
 0x2fc   : > { %v4622_v18 = vpop.f32.mrf.mxu0  ;;  %v4648_v41 = vpop.f32.mrf.mxu1 }
 0x2fd   : > { %v1701_v42 = vadd.f32 %v4622_v18, %v4192_v2  ;;  %v1832_v46 = vadd.f32 %v1831_v56, %v1671_v36 }
 0x2fe   : > { %v1690_v23 = vpop.f32.mrf.mxu0  ;;  %v6177_v26 = vpop.f32.mrf.mxu1 }
 0x2ff   : > { %v1691_v58 = vadd.f32 %v4192_v2, %v1690_v23  ;;  %v1850_v6 = vadd.f32 %v4642_v48, %v1701_v42 }
 0x300   : > { %v4625_v47 = vpop.f32.mrf.mxu0  ;;  %v4679_v5 = vpop.f32.mrf.mxu1 }
 0x301   : > { %v1721_v60 = vadd.f32 %v4625_v47, %v4192_v2  ;;  %v1844_v34 = vadd.f32 %v1843_v49, %v1691_v58 }
 0x302   : > { %v1710_v50 = vpop.f32.mrf.mxu0  ;;  %v2079_v12 = vpop.f32.mrf.mxu1 }
 0x303   : > { %v1711_v14 = vadd.f32 %v4192_v2, %v1710_v50  ;;  %v1862_v59 = vadd.f32 %v4645_v1, %v1721_v60 }
 0x304   : > { %v4628_v52 = vpop.f32.mrf.mxu0  ;;  %v4682_v8 = vpop.f32.mrf.mxu1 }
 0x305   : > { %v1741_v38 = vadd.f32 %v4628_v52, %v4192_v2  ;;  %v1856_v32 = vadd.f32 %v1855_v54, %v1711_v14 }
 0x306   : > { %v1730_v55 = vpop.f32.mrf.mxu0  ;;  %v2095_v57 = vpop.f32.mrf.mxu1 }
 0x307   : > { %v1731_v11 = vadd.f32 %v4192_v2, %v1730_v55  ;;  %v1874_v48 = vadd.f32 %v4648_v41, %v1741_v38 }
 0x308   : > { %v4659_v61 = vpop.f32.mrf.mxu0  ;;  %v6179_v63 = vpop.f32.mrf.mxu1 }
 0x309   : > { %v1961_v62 = vadd.f32 %v4659_v61, %v1838_v43  ;;  %v1868_v23 = vadd.f32 %v6177_v26, %v1731_v11 }
 0x30a   : > { %v1953_v3 = vpop.f32.mrf.mxu0  ;;  %v6184_v4 = vpop.f32.mrf.mxu1 }
 0x30b   : > { %v1954_v0 = vadd.f32 %v1953_v3, %v1832_v46  ;;  %v2088_v37 = vadd.f32 %v4679_v5, %v1961_v62 }
 0x30c   : > { %v4662_v9 = vpop.f32.mrf.mxu0  ;;  %v6186_v13 = vpop.f32.mrf.mxu1 }
 0x30d   : > { %v1975_v16 = vadd.f32 %v4662_v9, %v1850_v6  ;;  %v2080_v39 = vadd.f32 %v2079_v12, %v1954_v0 }
 0x30e   : > { %v1967_v24 = vpop.f32.mrf.mxu0  ;;  %v6188_v33 = vpop.f32.mrf.mxu1 }
 0x30f   : > { %v1968_v7 = vadd.f32 %v1967_v24, %v1844_v34  ;;  %v2104_v56 = vadd.f32 %v4682_v8, %v1975_v16 }
 0x310   : > { %v4665_v29 = vpop.f32.mrf.mxu0  ;;  %v4719_v17 = vpop.f32.mrf.mxu1 }
 0x311   : > { %v1989_v45 = vadd.f32 %v4665_v29, %v1862_v59  ;;  %v2096_v18 = vadd.f32 %v2095_v57, %v1968_v7  ;;  %v4193_v59 = vld [vmem:[%s6308_s6] ss:$0 sm:$0xff] }
 0x312   : > { %v1981_v44 = vpop.f32.mrf.mxu0  ;;  %v2335_v28 = vpop.f32.mrf.mxu1 }
 0x313   : > { %v1982_v1 = vadd.f32 %v1981_v44, %v1856_v32  ;;  %v2120_v41 = vadd.f32 %v6179_v63, %v1989_v45 }
 0x314   : > { %v4668_v20 = vpop.f32.mrf.mxu0  ;;  %v4722_v21 = vpop.f32.mrf.mxu1 }
 0x315   : > { %v2003_v50 = vadd.f32 %v4668_v20, %v1874_v48  ;;  %v2112_v26 = vadd.f32 %v6184_v4, %v1982_v1 }
 0x316   : > { %v1995_v10 = vpop.f32.mrf.mxu0  ;;  %v2347_v27 = vpop.f32.mrf.mxu1 }
 0x317   : > { %v1996_v61 = vadd.f32 %v1995_v10, %v1868_v23  ;;  %v2136_v63 = vadd.f32 %v6186_v13, %v2003_v50 }
 0x318   : > { %v4699_v25 = vpop.f32.mrf.mxu0  ;;  %v4725_v30 = vpop.f32.mrf.mxu1 }
 0x319   : > { %v2225_v31 = vadd.f32 %v4699_v25, %v2088_v37  ;;  %v2128_v43 = vadd.f32 %v6188_v33, %v1996_v61 }
 0x31a   : > { %v2218_v15 = vpop.f32.mrf.mxu0  ;;  %v2359_v35 = vpop.f32.mrf.mxu1 }
 0x31b   : > { %v2342_v22 = vadd.f32 %v4719_v17, %v2225_v31  ;;  %v2219_v40 = vadd.f32 %v2218_v15, %v2080_v39 }
 0x31c   : > { %v4702_v49 = vpop.f32.mrf.mxu0  ;;  %v4728_v51 = vpop.f32.mrf.mxu1 }
 0x31d   : > { %2382 = vst.msk [vmem:[%s6198_s22 + $0x8] sm:$0xff] %vm499_vm1, %v2342_v22  ;;  %v2336_v53 = vadd.f32 %v2335_v28, %v2219_v40  ;;  %v2237_v54 = vadd.f32 %v4702_v49, %v2104_v56 }
 0x31e   : > { %v2230_v47 = vpop.f32.mrf.mxu0  ;;  %v2371_v5 = vpop.f32.mrf.mxu1 }
 0x31f   : > { %2381 = vst.msk [vmem:[%s6198_s22] sm:$0xff] %vm499_vm1, %v2336_v53  ;;  %v2354_v12 = vadd.f32 %v4722_v21, %v2237_v54  ;;  %v2231_v52 = vadd.f32 %v2230_v47, %v2096_v18 }
 0x320   : > { %v4705_v8 = vpop.f32.mrf.mxu0  ;;  %v4759_v55 = vpop.f32.mrf.mxu1 }
 0x321   : > { %2384 = vst.msk [vmem:[%s6198_s22 + $0x18] sm:$0xff] %vm499_vm1, %v2354_v12  ;;  %v2348_v2 = vadd.f32 %v2347_v27, %v2231_v52  ;;  %v2249_v57 = vadd.f32 %v4705_v8, %v2120_v41 }
 0x322   : > { %v2242_v3 = vpop.f32.mrf.mxu0  ;;  %v2636_v9 = vpop.f32.mrf.mxu1 }
 0x323   : > { %2383 = vst.msk [vmem:[%s6198_s22 + $0x10] sm:$0xff] %vm499_vm1, %v2348_v2  ;;  %v2366_v19 = vadd.f32 %v4725_v30, %v2249_v57  ;;  %v2243_v24 = vadd.f32 %v2242_v3, %v2112_v26 }
 0x324   : > { %v4708_v36 = vpop.f32.mrf.mxu0  ;;  %v4762_v29 = vpop.f32.mrf.mxu1 }
 0x325   : > { %2386 = vst.msk [vmem:[%s6198_s22 + $0x28] sm:$0xff] %vm499_vm1, %v2366_v19  ;;  %v2360_v17 = vadd.f32 %v2359_v35, %v2243_v24  ;;  %v2261_v42 = vadd.f32 %v4708_v36, %v2136_v63 }
 0x326   : > { %v2254_v44 = vpop.f32.mrf.mxu0  ;;  %v2648_v4 = vpop.f32.mrf.mxu1 }
 0x327   : > { %2385 = vst.msk [vmem:[%s6198_s22 + $0x20] sm:$0xff] %vm499_vm1, %v2360_v17  ;;  %v2378_v28 = vadd.f32 %v4728_v51, %v2261_v42  ;;  %v2255_v58 = vadd.f32 %v2254_v44, %v2128_v43 }
 0x328   : > { %v4739_v62 = vpop.f32.mrf.mxu0  ;;  %v4765_v46 = vpop.f32.mrf.mxu1 }
 0x329   : > { %2388 = vst.msk [vmem:[%s6198_s22 + $0x38] sm:$0xff] %vm499_vm1, %v2378_v28  ;;  %v2372_v13 = vadd.f32 %v2371_v5, %v2255_v58  ;;  %v2486_v32 = vadd.f32 %v4739_v62, %v4193_v59 }
 0x32a   : > { %v2475_v20 = vpop.f32.mrf.mxu0  ;;  %v2660_v21 = vpop.f32.mrf.mxu1 }
 0x32b   : > { %2387 = vst.msk [vmem:[%s6198_s22 + $0x30] sm:$0xff] %vm499_vm1, %v2372_v13  ;;  %v2476_v45 = vadd.f32 %v4193_v59, %v2475_v20  ;;  %v2643_v48 = vadd.f32 %v4759_v55, %v2486_v32 }
 0x32c   : > { %v4742_v60 = vpop.f32.mrf.mxu0  ;;  %v4768_v0 = vpop.f32.mrf.mxu1 }
 0x32d   : > { %v2506_v56 = vadd.f32 %v4742_v60, %v4193_v59  ;;  %v2637_v54 = vadd.f32 %v2636_v9, %v2476_v45 }
 0x32e   : > { %v2495_v6 = vpop.f32.mrf.mxu0  ;;  %v6221_v14 = vpop.f32.mrf.mxu1 }
 0x32f   : > { %v2496_v1 = vadd.f32 %v4193_v59, %v2495_v6  ;;  %v2655_v50 = vadd.f32 %v4762_v29, %v2506_v56 }
 0x330   : > { %v4745_v33 = vpop.f32.mrf.mxu0 }
 0x331   : > { %v4799_v10 = vpop.f32.mrf.mxu1  ;;  %v2526_v47 = vadd.f32 %v4745_v33, %v4193_v59  ;;  %v2649_v61 = vadd.f32 %v2648_v4, %v2496_v1 }
 0x332   : > { %v2515_v27 = vpop.f32.mrf.mxu0 }
 0x333   : > { %v2884_v16 = vpop.f32.mrf.mxu1  ;;  %v2516_v52 = vadd.f32 %v4193_v59, %v2515_v27  ;;  %v2667_v19 = vadd.f32 %v4765_v46, %v2526_v47 }
 0x334   : > { %v4748_v34 = vpop.f32.mrf.mxu0 }
 0x335   : > { %v4802_v37 = vpop.f32.mrf.mxu1  ;;  %v2546_v26 = vadd.f32 %v4748_v34, %v4193_v59  ;;  %v2661_v17 = vadd.f32 %v2660_v21, %v2516_v52 }
 0x336   : > { %v2535_v38 = vpop.f32.mrf.mxu0 }
 0x337   : > { %v2900_v25 = vpop.f32.mrf.mxu1  ;;  %v2536_v36 = vadd.f32 %v4193_v59, %v2535_v38  ;;  %v2679_v58 = vadd.f32 %v4768_v0, %v2546_v26 }
 0x338   : > { %v4779_v30 = vpop.f32.mrf.mxu0 }
 0x339   : > { %v4805_v7 = vpop.f32.mrf.mxu1  ;;  %v2766_v53 = vadd.f32 %v4779_v30, %v2643_v48  ;;  %v2673_v6 = vadd.f32 %v6221_v14, %v2536_v36 }
 0x33a   : > { %v2758_v31 = vpop.f32.mrf.mxu0 }
 0x33b   : > { %v6226_v39 = vpop.f32.mrf.mxu1  ;;  %v2759_v5 = vadd.f32 %v2758_v31, %v2637_v54  ;;  %v2893_v57 = vadd.f32 %v4799_v10, %v2766_v53 }
 0x33c   : > { %v4782_v11 = vpop.f32.mrf.mxu0 }
 0x33d   : > { %v6228_v15 = vpop.f32.mrf.mxu1  ;;  %v2780_v8 = vadd.f32 %v4782_v11, %v2655_v50  ;;  %v2885_v9 = vadd.f32 %v2884_v16, %v2759_v5 }
 0x33e   : > { %v2772_v35 = vpop.f32.mrf.mxu0 }
 0x33f   : > { %v6230_v22 = vpop.f32.mrf.mxu1  ;;  %v2773_v3 = vadd.f32 %v2772_v35, %v2649_v61  ;;  %v2909_v28 = vadd.f32 %v4802_v37, %v2780_v8 }
 0x340   : > { %v4785_v40 = vpop.f32.mrf.mxu0 }
 0x341   : > { %v4839_v49 = vpop.f32.mrf.mxu1  ;;  %v2794_v42 = vadd.f32 %v4785_v40, %v2667_v19  ;;  %v2901_v60 = vadd.f32 %v2900_v25, %v2773_v3 }
 0x342   : > { %v2786_v51 = vpop.f32.mrf.mxu0 }
 0x343   : > { %v3140_v18 = vpop.f32.mrf.mxu1  ;;  %v2787_v46 = vadd.f32 %v2786_v51, %v2661_v17  ;;  %v2925_v0 = vadd.f32 %v4805_v7, %v2794_v42 }
 0x344   : > { %v4788_v23 = vpop.f32.mrf.mxu0 }
 0x345   : > { %v4842_v12 = vpop.f32.mrf.mxu1  ;;  %v2808_v10 = vadd.f32 %v4788_v23, %v2679_v58  ;;  %v2917_v14 = vadd.f32 %v6226_v39, %v2787_v46 }
 0x346   : > { %v2800_v41 = vpop.f32.mrf.mxu0 }
 0x347   : > { %v3152_v2 = vpop.f32.mrf.mxu1  ;;  %v2801_v38 = vadd.f32 %v2800_v41, %v2673_v6  ;;  %v2941_v45 = vadd.f32 %v6228_v15, %v2808_v10 }
 0x348   : > { %v4819_v55 = vpop.f32.mrf.mxu0 }
 0x349   : > { %v3030_v24 = vadd.f32 %v4819_v55, %v2893_v57  ;;  %v4845_v63 = vpop.f32.mrf.mxu1 }
 0x34a   : > { %v3023_v29 = vpop.f32.mrf.mxu0 }
 0x34b   : > { %v3147_v43 = vadd.f32 %v4839_v49, %v3030_v24  ;;  %v3024_v44 = vadd.f32 %v3023_v29, %v2885_v9  ;;  %v3164_v4 = vpop.f32.mrf.mxu1  ;;  %v2933_v49 = vadd.f32 %v6230_v22, %v2801_v38  ;;  %v4194_v24 = vld [vmem:[%s6309_s7] ss:$0 sm:$0xff] }
 0x34c   : > { %v4822_v62 = vpop.f32.mrf.mxu0 }
 0x34d   : > { %3187 = vst.msk [vmem:[%s6236_s16 + $0x8] sm:$0xff] %vm499_vm1, %v3147_v43  ;;  %v3141_v13 = vadd.f32 %v3140_v18, %v3024_v44  ;;  %v3042_v20 = vadd.f32 %v4822_v62, %v2909_v28  ;;  %v4848_v21 = vpop.f32.mrf.mxu1 }
 0x34e   : > { %v3035_v33 = vpop.f32.mrf.mxu0 }
 0x34f   : > { %3186 = vst.msk [vmem:[%s6236_s16] sm:$0xff] %vm499_vm1, %v3141_v13  ;;  %v3159_v27 = vadd.f32 %v4842_v12, %v3042_v20  ;;  %v3036_v16 = vadd.f32 %v3035_v33, %v2901_v60  ;;  %v3176_v34 = vpop.f32.mrf.mxu1 }
 0x350   : > { %v4825_v37 = vpop.f32.mrf.mxu0 }
 0x351   : > { %3189 = vst.msk [vmem:[%s6236_s16 + $0x18] sm:$0xff] %vm499_vm1, %v3159_v27  ;;  %v3153_v30 = vadd.f32 %v3152_v2, %v3036_v16  ;;  %v3054_v59 = vadd.f32 %v4825_v37, %v2925_v0  ;;  %v4879_v25 = vpop.f32.mrf.mxu1 }
 0x352   : > { %v3047_v31 = vpop.f32.mrf.mxu0 }
 0x353   : > { %3188 = vst.msk [vmem:[%s6236_s16 + $0x10] sm:$0xff] %vm499_vm1, %v3153_v30  ;;  %v3171_v11 = vadd.f32 %v4845_v63, %v3054_v59  ;;  %v3048_v32 = vadd.f32 %v3047_v31, %v2917_v14  ;;  %v3441_v35 = vpop.f32.mrf.mxu1 }
 0x354   : > { %v4828_v7 = vpop.f32.mrf.mxu0 }
 0x355   : > { %3191 = vst.msk [vmem:[%s6236_s16 + $0x28] sm:$0xff] %vm499_vm1, %v3171_v11  ;;  %v3165_v40 = vadd.f32 %v3164_v4, %v3048_v32  ;;  %v3066_v56 = vadd.f32 %v4828_v7, %v2941_v45  ;;  %v4882_v48 = vpop.f32.mrf.mxu1 }
 0x356   : > { %v3059_v51 = vpop.f32.mrf.mxu0 }
 0x357   : > { %3190 = vst.msk [vmem:[%s6236_s16 + $0x20] sm:$0xff] %vm499_vm1, %v3165_v40  ;;  %v3183_v39 = vadd.f32 %v4848_v21, %v3066_v56  ;;  %v3060_v1 = vadd.f32 %v3059_v51, %v2933_v49  ;;  %v3453_v53 = vpop.f32.mrf.mxu1 }
 0x358   : > { %v4859_v54 = vpop.f32.mrf.mxu0 }
 0x359   : > { %3193 = vst.msk [vmem:[%s6236_s16 + $0x38] sm:$0xff] %vm499_vm1, %v3183_v39  ;;  %v3177_v18 = vadd.f32 %v3176_v34, %v3060_v1  ;;  %v4885_v15 = vpop.f32.mrf.mxu1  ;;  %v3291_v17 = vadd.f32 %v4859_v54, %v4194_v24 }
 0x35a   : > { %v3280_v23 = vpop.f32.mrf.mxu0 }
 0x35b   : > { %3192 = vst.msk [vmem:[%s6236_s16 + $0x30] sm:$0xff] %vm499_vm1, %v3177_v18  ;;  %v3465_v47 = vpop.f32.mrf.mxu1  ;;  %v3281_v43 = vadd.f32 %v4194_v24, %v3280_v23  ;;  %v3448_v58 = vadd.f32 %v4879_v25, %v3291_v17 }
 0x35c   : > { %v4862_v5 = vpop.f32.mrf.mxu0 }
 0x35d   : > { %v4888_v50 = vpop.f32.mrf.mxu1  ;;  %v3311_v28 = vadd.f32 %v4862_v5, %v4194_v24  ;;  %v3442_v21 = vadd.f32 %v3441_v35, %v3281_v43 }
 0x35e   : > { %v3300_v12 = vpop.f32.mrf.mxu0 }
 0x35f   : > { %v3477_v52 = vpop.f32.mrf.mxu1  ;;  %v3301_v13 = vadd.f32 %v4194_v24, %v3300_v12  ;;  %v3460_v27 = vadd.f32 %v4882_v48, %v3311_v28 }
 0x360   : > { %v4865_v22 = vpop.f32.mrf.mxu0 }
 0x361   : > { %v4919_v41 = vpop.f32.mrf.mxu1  ;;  %v3331_v33 = vadd.f32 %v4865_v22, %v4194_v24  ;;  %v3454_v38 = vadd.f32 %v3453_v53, %v3301_v13 }
 0x362   : > { %v3320_v8 = vpop.f32.mrf.mxu0 }
 0x363   : > { %v3689_v61 = vpop.f32.mrf.mxu1  ;;  %v3321_v34 = vadd.f32 %v4194_v24, %v3320_v8  ;;  %v3472_v11 = vadd.f32 %v4885_v15, %v3331_v33 }
 0x364   : > { %v4868_v2 = vpop.f32.mrf.mxu0 }
 0x365   : > { %v4922_v57 = vpop.f32.mrf.mxu1  ;;  %v3351_v59 = vadd.f32 %v4868_v2, %v4194_v24  ;;  %v3466_v7 = vadd.f32 %v3465_v47, %v3321_v34 }
 0x366   : > { %v3340_v26 = vpop.f32.mrf.mxu0 }
 0x367   : > { %v3705_v55 = vpop.f32.mrf.mxu1  ;;  %v3341_v35 = vadd.f32 %v4194_v24, %v3340_v26  ;;  %v3484_v39 = vadd.f32 %v4888_v50, %v3351_v59 }
 0x368   : > { %v4899_v3 = vpop.f32.mrf.mxu0 }
 0x369   : > { %v4925_v19 = vpop.f32.mrf.mxu1  ;;  %v3571_v20 = vadd.f32 %v4899_v3, %v3448_v58  ;;  %v3478_v47 = vadd.f32 %v3477_v52, %v3341_v35 }
 0x36a   : > { %v3563_v63 = vpop.f32.mrf.mxu0 }
 0x36b   : > { %v3721_v9 = vpop.f32.mrf.mxu1  ;;  %v3564_v10 = vadd.f32 %v3563_v63, %v3442_v21  ;;  %v3698_v30 = vadd.f32 %v4919_v41, %v3571_v20 }
 0x36c   : > { %v4902_v36 = vpop.f32.mrf.mxu0 }
 0x36d   : > { %v6261_v29 = vpop.f32.mrf.mxu1  ;;  %v3585_v37 = vadd.f32 %v4902_v36, %v3460_v27  ;;  %v3690_v45 = vadd.f32 %v3689_v61, %v3564_v10 }
 0x36e   : > { %v3577_v42 = vpop.f32.mrf.mxu0 }
 0x36f   : > { %v6263_v44 = vpop.f32.mrf.mxu1  ;;  %v3578_v31 = vadd.f32 %v3577_v42, %v3454_v38  ;;  %v3714_v51 = vadd.f32 %v4922_v57, %v3585_v37 }
 0x370   : > { %v4905_v4 = vpop.f32.mrf.mxu0 }
 0x371   : > { %v4959_v62 = vpop.f32.mrf.mxu1  ;;  %v3599_v56 = vadd.f32 %v4905_v4, %v3472_v11  ;;  %v3706_v23 = vadd.f32 %v3705_v55, %v3578_v31 }
 0x372   : > { %v3591_v46 = vpop.f32.mrf.mxu0 }
 0x373   : > { %v3945_v60 = vpop.f32.mrf.mxu1  ;;  %v3592_v54 = vadd.f32 %v3591_v46, %v3466_v7  ;;  %v3730_v8 = vadd.f32 %v4925_v19, %v3599_v56 }
 0x374   : > { %v4908_v6 = vpop.f32.mrf.mxu0 }
 0x375   : > { %v4962_v16 = vpop.f32.mrf.mxu1  ;;  %v3613_v12 = vadd.f32 %v4908_v6, %v3484_v39  ;;  %v3722_v3 = vadd.f32 %v3721_v9, %v3592_v54 }
 0x376   : > { %v3605_v0 = vpop.f32.mrf.mxu0 }
 0x377   : > { %v3957_v14 = vpop.f32.mrf.mxu1  ;;  %v3606_v2 = vadd.f32 %v3605_v0, %v3478_v47  ;;  %v3746_v63 = vadd.f32 %v6261_v29, %v3613_v12 }
 0x378   : > { %v4939_v25 = vpop.f32.mrf.mxu0 }
 0x379   : > { %v3835_v32 = vadd.f32 %v4939_v25, %v3698_v30  ;;  %v4965_v1 = vpop.f32.mrf.mxu1  ;;  %v3738_v43 = vadd.f32 %v6263_v44, %v3606_v2 }
 0x37a   : > { %v3828_v40 = vpop.f32.mrf.mxu0 }
 0x37b   : > { %v3952_v48 = vadd.f32 %v4959_v62, %v3835_v32  ;;  %v3829_v49 = vadd.f32 %v3828_v40, %v3690_v45  ;;  %v3969_v50 = vpop.f32.mrf.mxu1 }
 0x37c   : > { %v4942_v53 = vpop.f32.mrf.mxu0 }
 0x37d   : > { %3992 = vst.msk [vmem:[%s6269_s30 + $0x8] sm:$0xff] %vm499_vm1, %v3952_v48  ;;  %v3946_v18 = vadd.f32 %v3945_v60, %v3829_v49  ;;  %v3847_v15 = vadd.f32 %v4942_v53, %v3714_v51  ;;  %v4968_v36 = vpop.f32.mrf.mxu1 }
 0x37e   : > { %v3840_v5 = vpop.f32.mrf.mxu0 }
 0x37f   : > { %3991 = vst.msk [vmem:[%s6269_s30] sm:$0xff] %vm499_vm1, %v3946_v18  ;;  %v3964_v22 = vadd.f32 %v4962_v16, %v3847_v15  ;;  %v3841_v41 = vadd.f32 %v3840_v5, %v3706_v23  ;;  %v3981_v58 = vpop.f32.mrf.mxu1 }
 0x380   : > { %v4945_v61 = vpop.f32.mrf.mxu0 }
 0x381   : > { %3994 = vst.msk [vmem:[%s6269_s30 + $0x18] sm:$0xff] %vm499_vm1, %v3964_v22  ;;  %v3958_v57 = vadd.f32 %v3957_v14, %v3841_v41  ;;  %v3859_v26 = vadd.f32 %v4945_v61, %v3730_v8 }
 0x382   : > { %v3852_v55 = vpop.f32.mrf.mxu0 }
 0x383   : > { %3993 = vst.msk [vmem:[%s6269_s30 + $0x10] sm:$0xff] %vm499_vm1, %v3958_v57  ;;  %v3976_v52 = vadd.f32 %v4965_v1, %v3859_v26  ;;  %v3853_v24 = vadd.f32 %v3852_v55, %v3722_v3 }
 0x384   : > { %v4948_v19 = vpop.f32.mrf.mxu0 }
 0x385   : > { %3996 = vst.msk [vmem:[%s6269_s30 + $0x28] sm:$0xff] %vm499_vm1, %v3976_v52  ;;  %v3970_v17 = vadd.f32 %v3969_v50, %v3853_v24  ;;  %v3871_v42 = vadd.f32 %v4948_v19, %v3746_v63 }
 0x386   : > { %v3864_v4 = vpop.f32.mrf.mxu0 }
 0x387   : > { %3995 = vst.msk [vmem:[%s6269_s30 + $0x20] sm:$0xff] %vm499_vm1, %v3970_v17  ;;  %v3988_v9 = vadd.f32 %v4968_v36, %v3871_v42  ;;  %v3865_v28 = vadd.f32 %v3864_v4, %v3738_v43 }
 0x389   : > { %3998 = vst.msk [vmem:[%s6269_s30 + $0x38] sm:$0xff] %vm499_vm1, %v3988_v9  ;;  %v3982_v62 = vadd.f32 %v3981_v58, %v3865_v28 }
 0x38b   : > { %3997 = vst.msk [vmem:[%s6269_s30 + $0x30] sm:$0xff] %vm499_vm1, %v3982_v62 }
 0x38c PF: > { %p23_p8 = scmp.ge.s32.totalorder %s5385_s12, 4   ;;  %s6330_s13 = smov %s5221_s14 }
 0x38d   : > { %s6331_s14 = smov %s5225_s15  ;;  %s6332_s15 = smov %s5396_s21 }
 0x38e   : > { %s6333_s16 = smov %s5385_s12  ;;  %25 = sbr.rel (!%p23_p8) target bundleno = 5 (0x5), region = 132 }
 0x393   :  { %4052 = vsyncpa [#allocation3], 1 }
 0x394   :  { %4054 = vsyncpa [#allocation3 + $0x1], 1 }
 0x395   :  { %4055 = vsyncpa [#allocation5], 1 }
 0x396   :  { %4056 = vsyncpa [#allocation8], 1 }

</bundles_post_ra>
